<compile_context>
chip_gen: v7x
topology: tpu7x:2x2x1
jax: 0.10.0
libtpu: 0.0.40
codegen_flags: <defaults>
</compile_context>

<pallas_src>
import numpy as np
import jax
import jax.numpy as jnp
from jax.experimental import pallas as pl
from jax.experimental.pallas import tpu as pltpu


# ---------------- host-side builders for structured weight / selection matrices ----------------

def _conv_tap_matrices(w_hwio, width):
    """(3, 3, Cin, Cout) HWIO conv weights -> (3, width*Cin, width*Cout) f32 tap matrices.

    M[kh] maps one H-padded activation row laid out as (w, ci) on the lane axis to one
    output row laid out as (w, co); the kw shift and the W-boundary zero padding of the
    3x3 / pad=1 convolution are folded in.
    """
    w = np.asarray(w_hwio, np.float32)
    kh_n, kw_n, cin, cout = w.shape
    m = np.zeros((kh_n, width * cin, width * cout), np.float32)
    for kh in range(kh_n):
        for kw in range(kw_n):
            for wp in range(width):
                src = wp + kw - 1
                if 0 <= src < width:
                    m[kh, src * cin:(src + 1) * cin, wp * cout:(wp + 1) * cout] = w[kh, kw]
    return jnp.asarray(m)


def _pool_row_select(h):
    """(2, h//2, h) 0/1 matrices selecting even / odd rows (left-multiply)."""
    s = np.zeros((2, h // 2, h), np.float32)
    idx = np.arange(h // 2)
    s[0, idx, 2 * idx] = 1.0
    s[1, idx, 2 * idx + 1] = 1.0
    return jnp.asarray(s)


def _pool_col_select(width, c):
    """(2, width*c, (width//2)*c) 0/1 matrices selecting even / odd w lane groups."""
    t = np.zeros((2, width * c, (width // 2) * c), np.float32)
    for j in range(width // 2):
        for ci in range(c):
            t[0, (2 * j) * c + ci, j * c + ci] = 1.0
            t[1, (2 * j + 1) * c + ci, j * c + ci] = 1.0
    return jnp.asarray(t)


# ------------------------------------ fused Pallas kernel ------------------------------------

def _make_vgg_kernel(plan):
    """Build the fused kernel for a static layer plan.

    plan entries: ('conv', H, W, Cin, Cout) or ('pool', H, W, C).
    Kernel ref order: x, per-stage params, 6 FC refs, output, one VMEM pad scratch per conv.
    """
    n_stage_refs = sum(3 if st[0] == 'conv' else 2 for st in plan)
    n_conv = sum(1 for st in plan if st[0] == 'conv')

    def kernel(*refs):
        pos = 0
        x_ref = refs[pos]; pos += 1
        stage_refs = refs[pos:pos + n_stage_refs]; pos += n_stage_refs
        w1_ref, b1_ref, w2_ref, b2_ref, w3_ref, b3_ref = refs[pos:pos + 6]; pos += 6
        o_ref = refs[pos]; pos += 1
        pad_refs = refs[pos:pos + n_conv]

        y = x_ref[0]                                   # (H, W*Cin) lane-dense rows, f32
        si = 0
        pi = 0
        for st in plan:
            if st[0] == 'conv':
                _, h_l, w_l, _cin_l, cout_l = st
                m_ref, s_ref, c_ref = stage_refs[si:si + 3]; si += 3
                xp_ref = pad_refs[pi]; pi += 1
                # Zero-pad in H inside VMEM (no jnp.pad / HBM copy of the activation).
                xp_ref[...] = jnp.zeros_like(xp_ref)
                xp_ref[pl.ds(1, h_l), :] = y
                # 3x3 conv as 3 MXU matmuls (kw shift + W padding folded into m_ref).
                acc = jnp.zeros((h_l, w_l * cout_l), jnp.float32)
                for kh in range(3):
                    acc = acc + jnp.dot(xp_ref[pl.ds(kh, h_l), :], m_ref[kh],
                                        preferred_element_type=jnp.float32)
                # Folded eval-mode BatchNorm + ReLU.
                y = jnp.maximum(acc * s_ref[...] + c_ref[...], 0.0)
            else:
                # 2x2 / stride-2 maxpool via 0/1 selection matmuls + elementwise max.
                sh_ref, tw_ref = stage_refs[si:si + 2]; si += 2
                hmax = jnp.maximum(
                    jnp.dot(sh_ref[0], y, preferred_element_type=jnp.float32),
                    jnp.dot(sh_ref[1], y, preferred_element_type=jnp.float32))
                y = jnp.maximum(
                    jnp.dot(hmax, tw_ref[0], preferred_element_type=jnp.float32),
                    jnp.dot(hmax, tw_ref[1], preferred_element_type=jnp.float32))

        # FC head: Linear -> ReLU -> (Dropout=id) -> Linear -> ReLU -> (Dropout=id) -> Linear.
        # The NCHW flatten is folded into w1's row blocks, one block per remaining row of y.
        h1 = b1_ref[...]
        for r in range(y.shape[0]):
            h1 = h1 + jnp.dot(y[r:r + 1, :], w1_ref[r],
                              preferred_element_type=jnp.float32)
        h1 = jnp.maximum(h1, 0.0)
        h2 = jnp.maximum(
            jnp.dot(h1, w2_ref[...], preferred_element_type=jnp.float32) + b2_ref[...], 0.0)
        out = jnp.dot(h2, w3_ref[...], preferred_element_type=jnp.float32) + b3_ref[...]
        o_ref[0] = out.astype(o_ref.dtype)

    return kernel


def vgg_net_forward(x_nchw, plan, stage_params, fc_params, n_classes):
    B, in_ch, H, W = x_nchw.shape
    # NCHW -> lane-dense (B, H, W*C) rows: one tiny boundary transpose of the 8 KiB input.
    x_rows = jnp.transpose(x_nchw, (0, 2, 3, 1)).reshape(B, H, W * in_ch)

    flat_inputs = [x_rows]
    in_specs = [pl.BlockSpec((1, H, W * in_ch), lambda b: (b, 0, 0))]

    def _const_spec(arr):
        nd = arr.ndim
        return pl.BlockSpec(arr.shape, lambda b, _nd=nd: (0,) * _nd)

    for p in stage_params:
        for arr in p:
            flat_inputs.append(arr)
            in_specs.append(_const_spec(arr))
    for arr in fc_params:
        flat_inputs.append(arr)
        in_specs.append(_const_spec(arr))

    # One small VMEM scratch per conv layer for the H-padded row buffer.
    scratch_shapes = [pltpu.VMEM((st[1] + 2, st[2] * st[3]), jnp.float32)
                      for st in plan if st[0] == 'conv']

    out = pl.pallas_call(
        _make_vgg_kernel(plan),
        out_shape=jax.ShapeDtypeStruct((B, 1, n_classes), jnp.float32),
        grid=(B,),
        in_specs=in_specs,
        out_specs=pl.BlockSpec((1, 1, n_classes), lambda b: (b, 0, 0)),
        scratch_shapes=scratch_shapes,
        compiler_params=pltpu.CompilerParams(dimension_semantics=("parallel",)),
    )(*flat_inputs)
    return out[:, 0, :]


# --------------------------------- parameter creation / packing ---------------------------------

def init_params(key, in_ch, arch, H, W, fc_hidden, n_classes):
    """Generate PyTorch-equivalent parameters and pre-pack them for the fused kernel."""
    eps = 1e-5
    plan = []
    stage_params = []
    cin, h_l, w_l = in_ch, H, W
    for a in arch:
        if a == 'M':
            plan.append(('pool', h_l, w_l, cin))
            stage_params.append((_pool_row_select(h_l), _pool_col_select(w_l, cin)))
            h_l, w_l = h_l // 2, w_l // 2
        else:
            cout = a
            key, k_w, k_b, k_g, k_be, k_m, k_v = jax.random.split(key, 7)
            w_oihw = jax.random.normal(k_w, (cout, cin, 3, 3), jnp.float32) * \
                (1.0 / (3 * 3 * cin)) ** 0.5                       # PyTorch OIHW weight
            b_conv = jax.random.normal(k_b, (cout,), jnp.float32) * 0.05
            gamma = 1.0 + 0.1 * jax.random.normal(k_g, (cout,), jnp.float32)
            beta = 0.1 * jax.random.normal(k_be, (cout,), jnp.float32)
            r_mean = 0.1 * jax.random.normal(k_m, (cout,), jnp.float32)
            r_var = jnp.abs(jax.random.normal(k_v, (cout,), jnp.float32)) + 0.5
            scale = gamma / jnp.sqrt(r_var + eps)                  # fold BN (eval mode)
            bias = (b_conv - r_mean) * scale + beta
            w_hwio = jnp.transpose(w_oihw, (2, 3, 1, 0))           # OIHW -> HWIO
            m = _conv_tap_matrices(w_hwio, w_l)                    # (3, W*Cin, W*Cout)
            s_row = jnp.tile(scale, w_l).reshape(1, w_l * cout)    # per-(w,co) column scale
            c_row = jnp.tile(bias, w_l).reshape(1, w_l * cout)
            plan.append(('conv', h_l, w_l, cin, cout))
            stage_params.append((m, s_row, c_row))
            cin = cout

    # FC head; PyTorch flattens NCHW, so fold that permutation into w1's rows at init.
    c_f, h_f, w_f = cin, h_l, w_l
    fc_in = c_f * h_f * w_f
    dims = [(fc_in, fc_hidden), (fc_hidden, fc_hidden), (fc_hidden, n_classes)]
    ws, bs = [], []
    for (din, dout) in dims:
        key, kw_, kb_ = jax.random.split(key, 3)
        ws.append(jax.random.normal(kw_, (dout, din), jnp.float32) * (1.0 / din) ** 0.5)
        bs.append(jax.random.normal(kb_, (dout,), jnp.float32) * 0.05)

    perm = np.zeros((h_f, w_f, c_f), np.int64)
    for hh in range(h_f):
        for ww in range(w_f):
            for cc in range(c_f):
                perm[hh, ww, cc] = cc * h_f * w_f + hh * w_f + ww   # NHWC pos -> NCHW index
    perm = jnp.asarray(perm.reshape(-1))
    w1_blk = jnp.transpose(ws[0])[perm].reshape(h_f, w_f * c_f, fc_hidden)

    fc_params = [
        w1_blk, bs[0].reshape(1, fc_hidden),
        jnp.transpose(ws[1]), bs[1].reshape(1, fc_hidden),
        jnp.transpose(ws[2]), bs[2].reshape(1, n_classes),
    ]
    return plan, stage_params, fc_params


# --------------------------------------------- main ---------------------------------------------

if __name__ == "__main__":
    IN_CH = 4
    N_CLASSES = 10
    ARCH = [8, 'M', 16, 'M']        # small stand-in VGG config (ints=conv, 'M'=pool)
    B, H, W = 2, 16, 16
    FC_HIDDEN = 64                  # original module uses 512*7*7 -> 4096 (scaled down)

    key = jax.random.PRNGKey(0)
    key, kx = jax.random.split(key)
    x = jax.random.normal(kx, (B, IN_CH, H, W), jnp.float32)     # NCHW input
    plan, stage_params, fc_params = init_params(key, IN_CH, ARCH, H, W,
                                                FC_HIDDEN, N_CLASSES)

    out = vgg_net_forward(x, plan, stage_params, fc_params, N_CLASSES)
    out = jax.block_until_ready(out)
    assert out.shape == (B, N_CLASSES) and out.dtype == jnp.float32
    print("KERNEL_OK")
</pallas_src>

<mosaic_0001>
module attributes {stable_mosaic.version = 11 : i64} {
  func.func @kernel(%arg0: i32, %arg1: memref<1x16x64xf32, #tpu.memory_space<vmem>>, %arg2: memref<3x64x128xf32, #tpu.memory_space<vmem>>, %arg3: memref<1x128xf32, #tpu.memory_space<vmem>>, %arg4: memref<1x128xf32, #tpu.memory_space<vmem>>, %arg5: memref<2x8x16xf32, #tpu.memory_space<vmem>>, %arg6: memref<2x128x64xf32, #tpu.memory_space<vmem>>, %arg7: memref<3x64x128xf32, #tpu.memory_space<vmem>>, %arg8: memref<1x128xf32, #tpu.memory_space<vmem>>, %arg9: memref<1x128xf32, #tpu.memory_space<vmem>>, %arg10: memref<2x4x8xf32, #tpu.memory_space<vmem>>, %arg11: memref<2x128x64xf32, #tpu.memory_space<vmem>>, %arg12: memref<4x64x64xf32, #tpu.memory_space<vmem>>, %arg13: memref<1x64xf32, #tpu.memory_space<vmem>>, %arg14: memref<64x64xf32, #tpu.memory_space<vmem>>, %arg15: memref<1x64xf32, #tpu.memory_space<vmem>>, %arg16: memref<64x10xf32, #tpu.memory_space<vmem>>, %arg17: memref<1x10xf32, #tpu.memory_space<vmem>>, %arg18: memref<1x1x10xf32, #tpu.memory_space<vmem>>, %arg19: memref<18x64xf32, #tpu.memory_space<vmem>>, %arg20: memref<10x64xf32, #tpu.memory_space<vmem>>) attributes {dimension_semantics = [#tpu.dimension_semantics<parallel>], iteration_bounds = array<i64: 2>, scalar_prefetch = 0 : i64, scratch_operands = 2 : i64, tpu.core_type = #tpu.core_type<tc>, window_params = [{transform_indices = @transform_0, window_bounds = array<i64: 1, 16, 64>}, {pipeline_mode = #tpu.pipeline_mode<synchronous>, transform_indices = @transform_1, window_bounds = array<i64: 3, 64, 128>}, {pipeline_mode = #tpu.pipeline_mode<synchronous>, transform_indices = @transform_2, window_bounds = array<i64: 1, 128>}, {pipeline_mode = #tpu.pipeline_mode<synchronous>, transform_indices = @transform_3, window_bounds = array<i64: 1, 128>}, {pipeline_mode = #tpu.pipeline_mode<synchronous>, transform_indices = @transform_4, window_bounds = array<i64: 2, 8, 16>}, {pipeline_mode = #tpu.pipeline_mode<synchronous>, transform_indices = @transform_5, window_bounds = array<i64: 2, 128, 64>}, {pipeline_mode = #tpu.pipeline_mode<synchronous>, transform_indices = @transform_6, window_bounds = array<i64: 3, 64, 128>}, {pipeline_mode = #tpu.pipeline_mode<synchronous>, transform_indices = @transform_7, window_bounds = array<i64: 1, 128>}, {pipeline_mode = #tpu.pipeline_mode<synchronous>, transform_indices = @transform_8, window_bounds = array<i64: 1, 128>}, {pipeline_mode = #tpu.pipeline_mode<synchronous>, transform_indices = @transform_9, window_bounds = array<i64: 2, 4, 8>}, {pipeline_mode = #tpu.pipeline_mode<synchronous>, transform_indices = @transform_10, window_bounds = array<i64: 2, 128, 64>}, {pipeline_mode = #tpu.pipeline_mode<synchronous>, transform_indices = @transform_11, window_bounds = array<i64: 4, 64, 64>}, {pipeline_mode = #tpu.pipeline_mode<synchronous>, transform_indices = @transform_12, window_bounds = array<i64: 1, 64>}, {pipeline_mode = #tpu.pipeline_mode<synchronous>, transform_indices = @transform_13, window_bounds = array<i64: 64, 64>}, {pipeline_mode = #tpu.pipeline_mode<synchronous>, transform_indices = @transform_14, window_bounds = array<i64: 1, 64>}, {pipeline_mode = #tpu.pipeline_mode<synchronous>, transform_indices = @transform_15, window_bounds = array<i64: 64, 10>}, {pipeline_mode = #tpu.pipeline_mode<synchronous>, transform_indices = @transform_16, window_bounds = array<i64: 1, 10>}, {transform_indices = @transform_17, window_bounds = array<i64: 1, 1, 10>}]} {
    %c0 = arith.constant 0 : index
    %c0_0 = arith.constant 0 : index
    %c0_1 = arith.constant 0 : index
    %0 = vector.load %arg1[%c0, %c0_0, %c0_1] : memref<1x16x64xf32, #tpu.memory_space<vmem>>, vector<1x16x64xf32>
    %1 = vector.shape_cast %0 : vector<1x16x64xf32> to vector<16x64xf32>
    %cst = arith.constant 0.000000e+00 : f32
    %2 = vector.broadcast %cst : f32 to vector<18x64xf32>
    %c0_2 = arith.constant 0 : index
    %c0_3 = arith.constant 0 : index
    %3 = vector.load %arg19[%c0_2, %c0_3] : memref<18x64xf32, #tpu.memory_space<vmem>>, vector<18x64xf32>
    tpu.vector_store %arg19[%c0_2, %c0_3], %2 {strides = array<i32>} : memref<18x64xf32, #tpu.memory_space<vmem>>, vector<18x64xf32>,
    %c1 = arith.constant 1 : index
    %c0_4 = arith.constant 0 : index
    %4 = vector.load %arg19[%c1, %c0_4] : memref<18x64xf32, #tpu.memory_space<vmem>>, vector<16x64xf32>
    tpu.vector_store %arg19[%c1, %c0_4], %1 {strides = array<i32>} : memref<18x64xf32, #tpu.memory_space<vmem>>, vector<16x64xf32>,
    %cst_5 = arith.constant 0.000000e+00 : f32
    %5 = vector.broadcast %cst_5 : f32 to vector<16x128xf32>
    %c0_6 = arith.constant 0 : index
    %c0_7 = arith.constant 0 : index
    %6 = vector.load %arg19[%c0_6, %c0_7] : memref<18x64xf32, #tpu.memory_space<vmem>>, vector<16x64xf32>
    %c0_8 = arith.constant 0 : index
    %c0_9 = arith.constant 0 : index
    %c0_10 = arith.constant 0 : index
    %7 = vector.load %arg2[%c0_8, %c0_9, %c0_10] : memref<3x64x128xf32, #tpu.memory_space<vmem>>, vector<1x64x128xf32>
    %8 = vector.shape_cast %7 : vector<1x64x128xf32> to vector<64x128xf32>
    %cst_11 = arith.constant dense<0.000000e+00> : vector<16x128xf32>
    %9 = tpu.matmul %6, %8, %cst_11 {dimension_numbers = #tpu.dot_dimension_numbers<[1], [0], [0], [1], [0, 0, 1, 1], [], []>} : vector<16x64xf32>, vector<64x128xf32>, vector<16x128xf32> -> vector<16x128xf32>
    %10 = arith.addf %5, %9 : vector<16x128xf32>
    %c1_12 = arith.constant 1 : index
    %c0_13 = arith.constant 0 : index
    %11 = vector.load %arg19[%c1_12, %c0_13] : memref<18x64xf32, #tpu.memory_space<vmem>>, vector<16x64xf32>
    %c1_14 = arith.constant 1 : index
    %c0_15 = arith.constant 0 : index
    %c0_16 = arith.constant 0 : index
    %12 = vector.load %arg2[%c1_14, %c0_15, %c0_16] : memref<3x64x128xf32, #tpu.memory_space<vmem>>, vector<1x64x128xf32>
    %13 = vector.shape_cast %12 : vector<1x64x128xf32> to vector<64x128xf32>
    %cst_17 = arith.constant dense<0.000000e+00> : vector<16x128xf32>
    %14 = tpu.matmul %11, %13, %cst_17 {dimension_numbers = #tpu.dot_dimension_numbers<[1], [0], [0], [1], [0, 0, 1, 1], [], []>} : vector<16x64xf32>, vector<64x128xf32>, vector<16x128xf32> -> vector<16x128xf32>
    %15 = arith.addf %10, %14 : vector<16x128xf32>
    %c2 = arith.constant 2 : index
    %c0_18 = arith.constant 0 : index
    %16 = vector.load %arg19[%c2, %c0_18] : memref<18x64xf32, #tpu.memory_space<vmem>>, vector<16x64xf32>
    %c2_19 = arith.constant 2 : index
    %c0_20 = arith.constant 0 : index
    %c0_21 = arith.constant 0 : index
    %17 = vector.load %arg2[%c2_19, %c0_20, %c0_21] : memref<3x64x128xf32, #tpu.memory_space<vmem>>, vector<1x64x128xf32>
    %18 = vector.shape_cast %17 : vector<1x64x128xf32> to vector<64x128xf32>
    %cst_22 = arith.constant dense<0.000000e+00> : vector<16x128xf32>
    %19 = tpu.matmul %16, %18, %cst_22 {dimension_numbers = #tpu.dot_dimension_numbers<[1], [0], [0], [1], [0, 0, 1, 1], [], []>} : vector<16x64xf32>, vector<64x128xf32>, vector<16x128xf32> -> vector<16x128xf32>
    %20 = arith.addf %15, %19 : vector<16x128xf32>
    %c0_23 = arith.constant 0 : index
    %c0_24 = arith.constant 0 : index
    %21 = vector.load %arg3[%c0_23, %c0_24] : memref<1x128xf32, #tpu.memory_space<vmem>>, vector<1x128xf32>
    %22 = vector.broadcast %21 : vector<1x128xf32> to vector<16x128xf32>
    %23 = arith.mulf %20, %22 : vector<16x128xf32>
    %c0_25 = arith.constant 0 : index
    %c0_26 = arith.constant 0 : index
    %24 = vector.load %arg4[%c0_25, %c0_26] : memref<1x128xf32, #tpu.memory_space<vmem>>, vector<1x128xf32>
    %25 = vector.broadcast %24 : vector<1x128xf32> to vector<16x128xf32>
    %26 = arith.addf %23, %25 : vector<16x128xf32>
    %cst_27 = arith.constant 0.000000e+00 : f32
    %27 = vector.broadcast %cst_27 : f32 to vector<16x128xf32>
    %28 = arith.maximumf %26, %27 : vector<16x128xf32>
    %c0_28 = arith.constant 0 : index
    %c0_29 = arith.constant 0 : index
    %c0_30 = arith.constant 0 : index
    %29 = vector.load %arg5[%c0_28, %c0_29, %c0_30] : memref<2x8x16xf32, #tpu.memory_space<vmem>>, vector<1x8x16xf32>
    %30 = vector.shape_cast %29 : vector<1x8x16xf32> to vector<8x16xf32>
    %cst_31 = arith.constant dense<0.000000e+00> : vector<8x128xf32>
    %31 = tpu.matmul %30, %28, %cst_31 {dimension_numbers = #tpu.dot_dimension_numbers<[1], [0], [0], [1], [0, 0, 1, 1], [], []>} : vector<8x16xf32>, vector<16x128xf32>, vector<8x128xf32> -> vector<8x128xf32>
    %c1_32 = arith.constant 1 : index
    %c0_33 = arith.constant 0 : index
    %c0_34 = arith.constant 0 : index
    %32 = vector.load %arg5[%c1_32, %c0_33, %c0_34] : memref<2x8x16xf32, #tpu.memory_space<vmem>>, vector<1x8x16xf32>
    %33 = vector.shape_cast %32 : vector<1x8x16xf32> to vector<8x16xf32>
    %cst_35 = arith.constant dense<0.000000e+00> : vector<8x128xf32>
    %34 = tpu.matmul %33, %28, %cst_35 {dimension_numbers = #tpu.dot_dimension_numbers<[1], [0], [0], [1], [0, 0, 1, 1], [], []>} : vector<8x16xf32>, vector<16x128xf32>, vector<8x128xf32> -> vector<8x128xf32>
    %35 = arith.maximumf %31, %34 : vector<8x128xf32>
    %c0_36 = arith.constant 0 : index
    %c0_37 = arith.constant 0 : index
    %c0_38 = arith.constant 0 : index
    %36 = vector.load %arg6[%c0_36, %c0_37, %c0_38] : memref<2x128x64xf32, #tpu.memory_space<vmem>>, vector<1x128x64xf32>
    %37 = vector.shape_cast %36 : vector<1x128x64xf32> to vector<128x64xf32>
    %cst_39 = arith.constant dense<0.000000e+00> : vector<8x64xf32>
    %38 = tpu.matmul %35, %37, %cst_39 {dimension_numbers = #tpu.dot_dimension_numbers<[1], [0], [0], [1], [0, 0, 1, 1], [], []>} : vector<8x128xf32>, vector<128x64xf32>, vector<8x64xf32> -> vector<8x64xf32>
    %c1_40 = arith.constant 1 : index
    %c0_41 = arith.constant 0 : index
    %c0_42 = arith.constant 0 : index
    %39 = vector.load %arg6[%c1_40, %c0_41, %c0_42] : memref<2x128x64xf32, #tpu.memory_space<vmem>>, vector<1x128x64xf32>
    %40 = vector.shape_cast %39 : vector<1x128x64xf32> to vector<128x64xf32>
    %cst_43 = arith.constant dense<0.000000e+00> : vector<8x64xf32>
    %41 = tpu.matmul %35, %40, %cst_43 {dimension_numbers = #tpu.dot_dimension_numbers<[1], [0], [0], [1], [0, 0, 1, 1], [], []>} : vector<8x128xf32>, vector<128x64xf32>, vector<8x64xf32> -> vector<8x64xf32>
    %42 = arith.maximumf %38, %41 : vector<8x64xf32>
    %cst_44 = arith.constant 0.000000e+00 : f32
    %43 = vector.broadcast %cst_44 : f32 to vector<10x64xf32>
    %c0_45 = arith.constant 0 : index
    %c0_46 = arith.constant 0 : index
    %44 = vector.load %arg20[%c0_45, %c0_46] : memref<10x64xf32, #tpu.memory_space<vmem>>, vector<10x64xf32>
    tpu.vector_store %arg20[%c0_45, %c0_46], %43 {strides = array<i32>} : memref<10x64xf32, #tpu.memory_space<vmem>>, vector<10x64xf32>,
    %c1_47 = arith.constant 1 : index
    %c0_48 = arith.constant 0 : index
    %45 = vector.load %arg20[%c1_47, %c0_48] : memref<10x64xf32, #tpu.memory_space<vmem>>, vector<8x64xf32>
    tpu.vector_store %arg20[%c1_47, %c0_48], %42 {strides = array<i32>} : memref<10x64xf32, #tpu.memory_space<vmem>>, vector<8x64xf32>,
    %cst_49 = arith.constant 0.000000e+00 : f32
    %46 = vector.broadcast %cst_49 : f32 to vector<8x128xf32>
    %c0_50 = arith.constant 0 : index
    %c0_51 = arith.constant 0 : index
    %47 = vector.load %arg20[%c0_50, %c0_51] : memref<10x64xf32, #tpu.memory_space<vmem>>, vector<8x64xf32>
    %c0_52 = arith.constant 0 : index
    %c0_53 = arith.constant 0 : index
    %c0_54 = arith.constant 0 : index
    %48 = vector.load %arg7[%c0_52, %c0_53, %c0_54] : memref<3x64x128xf32, #tpu.memory_space<vmem>>, vector<1x64x128xf32>
    %49 = vector.shape_cast %48 : vector<1x64x128xf32> to vector<64x128xf32>
    %cst_55 = arith.constant dense<0.000000e+00> : vector<8x128xf32>
    %50 = tpu.matmul %47, %49, %cst_55 {dimension_numbers = #tpu.dot_dimension_numbers<[1], [0], [0], [1], [0, 0, 1, 1], [], []>} : vector<8x64xf32>, vector<64x128xf32>, vector<8x128xf32> -> vector<8x128xf32>
    %51 = arith.addf %46, %50 : vector<8x128xf32>
    %c1_56 = arith.constant 1 : index
    %c0_57 = arith.constant 0 : index
    %52 = vector.load %arg20[%c1_56, %c0_57] : memref<10x64xf32, #tpu.memory_space<vmem>>, vector<8x64xf32>
    %c1_58 = arith.constant 1 : index
    %c0_59 = arith.constant 0 : index
    %c0_60 = arith.constant 0 : index
    %53 = vector.load %arg7[%c1_58, %c0_59, %c0_60] : memref<3x64x128xf32, #tpu.memory_space<vmem>>, vector<1x64x128xf32>
    %54 = vector.shape_cast %53 : vector<1x64x128xf32> to vector<64x128xf32>
    %cst_61 = arith.constant dense<0.000000e+00> : vector<8x128xf32>
    %55 = tpu.matmul %52, %54, %cst_61 {dimension_numbers = #tpu.dot_dimension_numbers<[1], [0], [0], [1], [0, 0, 1, 1], [], []>} : vector<8x64xf32>, vector<64x128xf32>, vector<8x128xf32> -> vector<8x128xf32>
    %56 = arith.addf %51, %55 : vector<8x128xf32>
    %c2_62 = arith.constant 2 : index
    %c0_63 = arith.constant 0 : index
    %57 = vector.load %arg20[%c2_62, %c0_63] : memref<10x64xf32, #tpu.memory_space<vmem>>, vector<8x64xf32>
    %c2_64 = arith.constant 2 : index
    %c0_65 = arith.constant 0 : index
    %c0_66 = arith.constant 0 : index
    %58 = vector.load %arg7[%c2_64, %c0_65, %c0_66] : memref<3x64x128xf32, #tpu.memory_space<vmem>>, vector<1x64x128xf32>
    %59 = vector.shape_cast %58 : vector<1x64x128xf32> to vector<64x128xf32>
    %cst_67 = arith.constant dense<0.000000e+00> : vector<8x128xf32>
    %60 = tpu.matmul %57, %59, %cst_67 {dimension_numbers = #tpu.dot_dimension_numbers<[1], [0], [0], [1], [0, 0, 1, 1], [], []>} : vector<8x64xf32>, vector<64x128xf32>, vector<8x128xf32> -> vector<8x128xf32>
    %61 = arith.addf %56, %60 : vector<8x128xf32>
    %c0_68 = arith.constant 0 : index
    %c0_69 = arith.constant 0 : index
    %62 = vector.load %arg8[%c0_68, %c0_69] : memref<1x128xf32, #tpu.memory_space<vmem>>, vector<1x128xf32>
    %63 = vector.broadcast %62 : vector<1x128xf32> to vector<8x128xf32>
    %64 = arith.mulf %61, %63 : vector<8x128xf32>
    %c0_70 = arith.constant 0 : index
    %c0_71 = arith.constant 0 : index
    %65 = vector.load %arg9[%c0_70, %c0_71] : memref<1x128xf32, #tpu.memory_space<vmem>>, vector<1x128xf32>
    %66 = vector.broadcast %65 : vector<1x128xf32> to vector<8x128xf32>
    %67 = arith.addf %64, %66 : vector<8x128xf32>
    %cst_72 = arith.constant 0.000000e+00 : f32
    %68 = vector.broadcast %cst_72 : f32 to vector<8x128xf32>
    %69 = arith.maximumf %67, %68 : vector<8x128xf32>
    %c0_73 = arith.constant 0 : index
    %c0_74 = arith.constant 0 : index
    %c0_75 = arith.constant 0 : index
    %70 = vector.load %arg10[%c0_73, %c0_74, %c0_75] : memref<2x4x8xf32, #tpu.memory_space<vmem>>, vector<1x4x8xf32>
    %71 = vector.shape_cast %70 : vector<1x4x8xf32> to vector<4x8xf32>
    %cst_76 = arith.constant dense<0.000000e+00> : vector<4x128xf32>
    %72 = tpu.matmul %71, %69, %cst_76 {dimension_numbers = #tpu.dot_dimension_numbers<[1], [0], [0], [1], [0, 0, 1, 1], [], []>} : vector<4x8xf32>, vector<8x128xf32>, vector<4x128xf32> -> vector<4x128xf32>
    %c1_77 = arith.constant 1 : index
    %c0_78 = arith.constant 0 : index
    %c0_79 = arith.constant 0 : index
    %73 = vector.load %arg10[%c1_77, %c0_78, %c0_79] : memref<2x4x8xf32, #tpu.memory_space<vmem>>, vector<1x4x8xf32>
    %74 = vector.shape_cast %73 : vector<1x4x8xf32> to vector<4x8xf32>
    %cst_80 = arith.constant dense<0.000000e+00> : vector<4x128xf32>
    %75 = tpu.matmul %74, %69, %cst_80 {dimension_numbers = #tpu.dot_dimension_numbers<[1], [0], [0], [1], [0, 0, 1, 1], [], []>} : vector<4x8xf32>, vector<8x128xf32>, vector<4x128xf32> -> vector<4x128xf32>
    %76 = arith.maximumf %72, %75 : vector<4x128xf32>
    %c0_81 = arith.constant 0 : index
    %c0_82 = arith.constant 0 : index
    %c0_83 = arith.constant 0 : index
    %77 = vector.load %arg11[%c0_81, %c0_82, %c0_83] : memref<2x128x64xf32, #tpu.memory_space<vmem>>, vector<1x128x64xf32>
    %78 = vector.shape_cast %77 : vector<1x128x64xf32> to vector<128x64xf32>
    %cst_84 = arith.constant dense<0.000000e+00> : vector<4x64xf32>
    %79 = tpu.matmul %76, %78, %cst_84 {dimension_numbers = #tpu.dot_dimension_numbers<[1], [0], [0], [1], [0, 0, 1, 1], [], []>} : vector<4x128xf32>, vector<128x64xf32>, vector<4x64xf32> -> vector<4x64xf32>
    %c1_85 = arith.constant 1 : index
    %c0_86 = arith.constant 0 : index
    %c0_87 = arith.constant 0 : index
    %80 = vector.load %arg11[%c1_85, %c0_86, %c0_87] : memref<2x128x64xf32, #tpu.memory_space<vmem>>, vector<1x128x64xf32>
    %81 = vector.shape_cast %80 : vector<1x128x64xf32> to vector<128x64xf32>
    %cst_88 = arith.constant dense<0.000000e+00> : vector<4x64xf32>
    %82 = tpu.matmul %76, %81, %cst_88 {dimension_numbers = #tpu.dot_dimension_numbers<[1], [0], [0], [1], [0, 0, 1, 1], [], []>} : vector<4x128xf32>, vector<128x64xf32>, vector<4x64xf32> -> vector<4x64xf32>
    %83 = arith.maximumf %79, %82 : vector<4x64xf32>
    %c0_89 = arith.constant 0 : index
    %c0_90 = arith.constant 0 : index
    %84 = vector.load %arg13[%c0_89, %c0_90] : memref<1x64xf32, #tpu.memory_space<vmem>>, vector<1x64xf32>
    %85 = vector.extract_strided_slice %83 {offsets = [0, 0], sizes = [1, 64], strides = [1, 1]} : vector<4x64xf32> to vector<1x64xf32>
    %c0_91 = arith.constant 0 : index
    %c0_92 = arith.constant 0 : index
    %c0_93 = arith.constant 0 : index
    %86 = vector.load %arg12[%c0_91, %c0_92, %c0_93] : memref<4x64x64xf32, #tpu.memory_space<vmem>>, vector<1x64x64xf32>
    %87 = vector.shape_cast %86 : vector<1x64x64xf32> to vector<64x64xf32>
    %cst_94 = arith.constant dense<0.000000e+00> : vector<1x64xf32>
    %88 = tpu.matmul %85, %87, %cst_94 {dimension_numbers = #tpu.dot_dimension_numbers<[1], [0], [0], [1], [0, 0, 1, 1], [], []>} : vector<1x64xf32>, vector<64x64xf32>, vector<1x64xf32> -> vector<1x64xf32>
    %89 = arith.addf %84, %88 : vector<1x64xf32>
    %90 = vector.extract_strided_slice %83 {offsets = [1, 0], sizes = [1, 64], strides = [1, 1]} : vector<4x64xf32> to vector<1x64xf32>
    %c1_95 = arith.constant 1 : index
    %c0_96 = arith.constant 0 : index
    %c0_97 = arith.constant 0 : index
    %91 = vector.load %arg12[%c1_95, %c0_96, %c0_97] : memref<4x64x64xf32, #tpu.memory_space<vmem>>, vector<1x64x64xf32>
    %92 = vector.shape_cast %91 : vector<1x64x64xf32> to vector<64x64xf32>
    %cst_98 = arith.constant dense<0.000000e+00> : vector<1x64xf32>
    %93 = tpu.matmul %90, %92, %cst_98 {dimension_numbers = #tpu.dot_dimension_numbers<[1], [0], [0], [1], [0, 0, 1, 1], [], []>} : vector<1x64xf32>, vector<64x64xf32>, vector<1x64xf32> -> vector<1x64xf32>
    %94 = arith.addf %89, %93 : vector<1x64xf32>
    %95 = vector.extract_strided_slice %83 {offsets = [2, 0], sizes = [1, 64], strides = [1, 1]} : vector<4x64xf32> to vector<1x64xf32>
    %c2_99 = arith.constant 2 : index
    %c0_100 = arith.constant 0 : index
    %c0_101 = arith.constant 0 : index
    %96 = vector.load %arg12[%c2_99, %c0_100, %c0_101] : memref<4x64x64xf32, #tpu.memory_space<vmem>>, vector<1x64x64xf32>
    %97 = vector.shape_cast %96 : vector<1x64x64xf32> to vector<64x64xf32>
    %cst_102 = arith.constant dense<0.000000e+00> : vector<1x64xf32>
    %98 = tpu.matmul %95, %97, %cst_102 {dimension_numbers = #tpu.dot_dimension_numbers<[1], [0], [0], [1], [0, 0, 1, 1], [], []>} : vector<1x64xf32>, vector<64x64xf32>, vector<1x64xf32> -> vector<1x64xf32>
    %99 = arith.addf %94, %98 : vector<1x64xf32>
    %100 = vector.extract_strided_slice %83 {offsets = [3, 0], sizes = [1, 64], strides = [1, 1]} : vector<4x64xf32> to vector<1x64xf32>
    %c3 = arith.constant 3 : index
    %c0_103 = arith.constant 0 : index
    %c0_104 = arith.constant 0 : index
    %101 = vector.load %arg12[%c3, %c0_103, %c0_104] : memref<4x64x64xf32, #tpu.memory_space<vmem>>, vector<1x64x64xf32>
    %102 = vector.shape_cast %101 : vector<1x64x64xf32> to vector<64x64xf32>
    %cst_105 = arith.constant dense<0.000000e+00> : vector<1x64xf32>
    %103 = tpu.matmul %100, %102, %cst_105 {dimension_numbers = #tpu.dot_dimension_numbers<[1], [0], [0], [1], [0, 0, 1, 1], [], []>} : vector<1x64xf32>, vector<64x64xf32>, vector<1x64xf32> -> vector<1x64xf32>
    %104 = arith.addf %99, %103 : vector<1x64xf32>
    %cst_106 = arith.constant 0.000000e+00 : f32
    %105 = vector.broadcast %cst_106 : f32 to vector<1x64xf32>
    %106 = arith.maximumf %104, %105 : vector<1x64xf32>
    %c0_107 = arith.constant 0 : index
    %c0_108 = arith.constant 0 : index
    %107 = vector.load %arg14[%c0_107, %c0_108] : memref<64x64xf32, #tpu.memory_space<vmem>>, vector<64x64xf32>
    %cst_109 = arith.constant dense<0.000000e+00> : vector<1x64xf32>
    %108 = tpu.matmul %106, %107, %cst_109 {dimension_numbers = #tpu.dot_dimension_numbers<[1], [0], [0], [1], [0, 0, 1, 1], [], []>} : vector<1x64xf32>, vector<64x64xf32>, vector<1x64xf32> -> vector<1x64xf32>
    %c0_110 = arith.constant 0 : index
    %c0_111 = arith.constant 0 : index
    %109 = vector.load %arg15[%c0_110, %c0_111] : memref<1x64xf32, #tpu.memory_space<vmem>>, vector<1x64xf32>
    %110 = arith.addf %108, %109 : vector<1x64xf32>
    %cst_112 = arith.constant 0.000000e+00 : f32
    %111 = vector.broadcast %cst_112 : f32 to vector<1x64xf32>
    %112 = arith.maximumf %110, %111 : vector<1x64xf32>
    %c0_113 = arith.constant 0 : index
    %c0_114 = arith.constant 0 : index
    %113 = vector.load %arg16[%c0_113, %c0_114] : memref<64x10xf32, #tpu.memory_space<vmem>>, vector<64x10xf32>
    %cst_115 = arith.constant dense<0.000000e+00> : vector<1x10xf32>
    %114 = tpu.matmul %112, %113, %cst_115 {dimension_numbers = #tpu.dot_dimension_numbers<[1], [0], [0], [1], [0, 0, 1, 1], [], []>} : vector<1x64xf32>, vector<64x10xf32>, vector<1x10xf32> -> vector<1x10xf32>
    %c0_116 = arith.constant 0 : index
    %c0_117 = arith.constant 0 : index
    %115 = vector.load %arg17[%c0_116, %c0_117] : memref<1x10xf32, #tpu.memory_space<vmem>>, vector<1x10xf32>
    %116 = arith.addf %114, %115 : vector<1x10xf32>
    %c0_118 = arith.constant 0 : index
    %c0_119 = arith.constant 0 : index
    %c0_120 = arith.constant 0 : index
    %117 = vector.load %arg18[%c0_118, %c0_119, %c0_120] : memref<1x1x10xf32, #tpu.memory_space<vmem>>, vector<1x1x10xf32>
    %118 = vector.shape_cast %117 : vector<1x1x10xf32> to vector<1x10xf32>
    %119 = vector.shape_cast %116 : vector<1x10xf32> to vector<1x1x10xf32>
    tpu.vector_store %arg18[%c0_118, %c0_119, %c0_120], %119 {strides = array<i32>} : memref<1x1x10xf32, #tpu.memory_space<vmem>>, vector<1x1x10xf32>,
    return
  }
  func.func @transform_0(%arg0: i32) -> (i32, i32, i32) {
    %c0_i32 = arith.constant 0 : i32
    %c0_i32_0 = arith.constant 0 : i32
    %c0_i32_1 = arith.constant 0 : i32
    return %arg0, %c0_i32, %c0_i32_0 : i32, i32, i32
  }
  func.func @transform_1(%arg0: i32) -> (i32, i32, i32) {
    %c0_i32 = arith.constant 0 : i32
    %c0_i32_0 = arith.constant 0 : i32
    %c0_i32_1 = arith.constant 0 : i32
    %c0_i32_2 = arith.constant 0 : i32
    return %c0_i32, %c0_i32_0, %c0_i32_1 : i32, i32, i32
  }
  func.func @transform_2(%arg0: i32) -> (i32, i32) {
    %c0_i32 = arith.constant 0 : i32
    %c0_i32_0 = arith.constant 0 : i32
    %c0_i32_1 = arith.constant 0 : i32
    return %c0_i32, %c0_i32_0 : i32, i32
  }
  func.func @transform_3(%arg0: i32) -> (i32, i32) {
    %c0_i32 = arith.constant 0 : i32
    %c0_i32_0 = arith.constant 0 : i32
    %c0_i32_1 = arith.constant 0 : i32
    return %c0_i32, %c0_i32_0 : i32, i32
  }
  func.func @transform_4(%arg0: i32) -> (i32, i32, i32) {
    %c0_i32 = arith.constant 0 : i32
    %c0_i32_0 = arith.constant 0 : i32
    %c0_i32_1 = arith.constant 0 : i32
    %c0_i32_2 = arith.constant 0 : i32
    return %c0_i32, %c0_i32_0, %c0_i32_1 : i32, i32, i32
  }
  func.func @transform_5(%arg0: i32) -> (i32, i32, i32) {
    %c0_i32 = arith.constant 0 : i32
    %c0_i32_0 = arith.constant 0 : i32
    %c0_i32_1 = arith.constant 0 : i32
    %c0_i32_2 = arith.constant 0 : i32
    return %c0_i32, %c0_i32_0, %c0_i32_1 : i32, i32, i32
  }
  func.func @transform_6(%arg0: i32) -> (i32, i32, i32) {
    %c0_i32 = arith.constant 0 : i32
    %c0_i32_0 = arith.constant 0 : i32
    %c0_i32_1 = arith.constant 0 : i32
    %c0_i32_2 = arith.constant 0 : i32
    return %c0_i32, %c0_i32_0, %c0_i32_1 : i32, i32, i32
  }
  func.func @transform_7(%arg0: i32) -> (i32, i32) {
    %c0_i32 = arith.constant 0 : i32
    %c0_i32_0 = arith.constant 0 : i32
    %c0_i32_1 = arith.constant 0 : i32
    return %c0_i32, %c0_i32_0 : i32, i32
  }
  func.func @transform_8(%arg0: i32) -> (i32, i32) {
    %c0_i32 = arith.constant 0 : i32
    %c0_i32_0 = arith.constant 0 : i32
    %c0_i32_1 = arith.constant 0 : i32
    return %c0_i32, %c0_i32_0 : i32, i32
  }
  func.func @transform_9(%arg0: i32) -> (i32, i32, i32) {
    %c0_i32 = arith.constant 0 : i32
    %c0_i32_0 = arith.constant 0 : i32
    %c0_i32_1 = arith.constant 0 : i32
    %c0_i32_2 = arith.constant 0 : i32
    return %c0_i32, %c0_i32_0, %c0_i32_1 : i32, i32, i32
  }
  func.func @transform_10(%arg0: i32) -> (i32, i32, i32) {
    %c0_i32 = arith.constant 0 : i32
    %c0_i32_0 = arith.constant 0 : i32
    %c0_i32_1 = arith.constant 0 : i32
    %c0_i32_2 = arith.constant 0 : i32
    return %c0_i32, %c0_i32_0, %c0_i32_1 : i32, i32, i32
  }
  func.func @transform_11(%arg0: i32) -> (i32, i32, i32) {
    %c0_i32 = arith.constant 0 : i32
    %c0_i32_0 = arith.constant 0 : i32
    %c0_i32_1 = arith.constant 0 : i32
    %c0_i32_2 = arith.constant 0 : i32
    return %c0_i32, %c0_i32_0, %c0_i32_1 : i32, i32, i32
  }
  func.func @transform_12(%arg0: i32) -> (i32, i32) {
    %c0_i32 = arith.constant 0 : i32
    %c0_i32_0 = arith.constant 0 : i32
    %c0_i32_1 = arith.constant 0 : i32
    return %c0_i32, %c0_i32_0 : i32, i32
  }
  func.func @transform_13(%arg0: i32) -> (i32, i32) {
    %c0_i32 = arith.constant 0 : i32
    %c0_i32_0 = arith.constant 0 : i32
    %c0_i32_1 = arith.constant 0 : i32
    return %c0_i32, %c0_i32_0 : i32, i32
  }
  func.func @transform_14(%arg0: i32) -> (i32, i32) {
    %c0_i32 = arith.constant 0 : i32
    %c0_i32_0 = arith.constant 0 : i32
    %c0_i32_1 = arith.constant 0 : i32
    return %c0_i32, %c0_i32_0 : i32, i32
  }
  func.func @transform_15(%arg0: i32) -> (i32, i32) {
    %c0_i32 = arith.constant 0 : i32
    %c0_i32_0 = arith.constant 0 : i32
    %c0_i32_1 = arith.constant 0 : i32
    return %c0_i32, %c0_i32_0 : i32, i32
  }
  func.func @transform_16(%arg0: i32) -> (i32, i32) {
    %c0_i32 = arith.constant 0 : i32
    %c0_i32_0 = arith.constant 0 : i32
    %c0_i32_1 = arith.constant 0 : i32
    return %c0_i32, %c0_i32_0 : i32, i32
  }
  func.func @transform_17(%arg0: i32) -> (i32, i32, i32) {
    %c0_i32 = arith.constant 0 : i32
    %c0_i32_0 = arith.constant 0 : i32
    %c0_i32_1 = arith.constant 0 : i32
    return %arg0, %c0_i32, %c0_i32_0 : i32, i32, i32
  }
}

</mosaic_0001>

<bundles_post_ra>
// kernel: tpu_custom_call.1
= control target key start
LH: loop header
LB: loop body
LE: loop exit
PB: predicated region body
PF: predicated region fallthrough
CT: control target
= control target key end

     0   :  { %s4509_s0 = inlined_call_operand.hbm [shape: f32[2,16,64], index: 0, kind: input, shape index: {}]   ;;  %s4510_s1 = inlined_call_operand.vmem [shape: f32[3,64,128], index: 1, kind: input, shape index: {}]   ;;  %s4511_s2 = inlined_call_operand.hbm [shape: f32[1,128], index: 2, kind: input, shape index: {}]   ;;  %s4512_s3 = inlined_call_operand.vmem [shape: f32[1,128], index: 3, kind: input, shape index: {}]   ;;  %s4513_s4 = inlined_call_operand.vmem [shape: f32[2,8,16], index: 4, kind: input, shape index: {}]   ;;  %s4514_s5 = inlined_call_operand.vmem [shape: f32[2,128,64], index: 5, kind: input, shape index: {}]   ;;  %s4515_s6 = inlined_call_operand.vmem [shape: f32[3,64,128], index: 6, kind: input, shape index: {}]   ;;  %s4516_s7 = inlined_call_operand.vmem [shape: f32[1,128], index: 7, kind: input, shape index: {}]   ;;  %s4517_s8 = inlined_call_operand.vmem [shape: f32[1,128], index: 8, kind: input, shape index: {}]   ;;  %s4518_s9 = inlined_call_operand.vmem [shape: f32[2,4,8], index: 9, kind: input, shape index: {}]   ;;  %s4519_s10 = inlined_call_operand.vmem [shape: f32[2,128,64], index: 10, kind: input, shape index: {}]   ;;  %s4520_s11 = inlined_call_operand.vmem [shape: f32[4,64,64], index: 11, kind: input, shape index: {}]   ;;  %s4521_s12 = inlined_call_operand.vmem [shape: f32[1,64], index: 12, kind: input, shape index: {}]   ;;  %s4522_s13 = inlined_call_operand.vmem [shape: f32[64,64], index: 13, kind: input, shape index: {}]   ;;  %s4523_s14 = inlined_call_operand.vmem [shape: f32[1,64], index: 14, kind: input, shape index: {}]   ;;  %s4524_s15 = inlined_call_operand.vmem [shape: f32[64,10], index: 15, kind: input, shape index: {}]   ;;  %s4525_s16 = inlined_call_operand.vmem [shape: f32[1,10], index: 16, kind: input, shape index: {}]   ;;  %s4526_s17 = inlined_call_operand.hbm [shape: f32[2,1,10], index: 17, kind: output, shape index: {}]  }
   0x1   :  { %4544 = sst [smem:[#allocation19_spill]] %s4509_s0 }
   0x2   :  { %4545 = sst [smem:[#allocation20_spill]] %s4510_s1 }
   0x3   :  { %4546 = sst [smem:[#allocation21_spill]] %s4521_s12 }
   0x4   :  { %4547 = sst [smem:[#allocation22_spill]] %s4522_s13 }
   0x5   :  { %4548 = sst [smem:[#allocation23_spill]] %s4523_s14 }
   0x6   :  { %4549 = sst [smem:[#allocation24_spill]] %s4524_s15 }
   0x7   :  { %4550 = sst [smem:[#allocation25_spill]] %s4525_s16 }
   0x8   :  { %4551 = sst [smem:[#allocation26_spill]] %s4526_s17 }
   0x9   :  { %22 = vsyncpa [#allocation5], 0 }
   0xa   :  { %24 = vsyncpa [#allocation5 + $0x1], 0 }
   0xb   :  { %25 = vsyncpa [#allocation8], 0 }
   0xc   :  { %26 = vsyncpa [#allocation6], 0 }
   0xd   :  { %28 = vsyncpa [#allocation6 + $0x1], 0  ;;  %s3664_s24 = smov 0   ;;  %s3666_s25 = smov 0  }
   0xe   :  { %s3668_s26 = smov 0   ;;  %s3670_s27 = smov 0  }
   0xf LB: > { %4552 = sst [smem:[#allocation13_spill]] %s3552_s24  ;;  %s3685_s28 = sadd.s32 4294967295, %s3564_s27   ;;  %s3564_s27 = sphi %s3670_s27, %s4585_s27   ;;  %s3560_s26 = sphi %s3668_s26, %s4587_s26   ;;  %s3556_s25 = sphi %s3666_s25, %s4589_s25   ;;  %s3552_s24 = sphi %s3664_s24, %s4588_s24  }
  0x10   : > { %4553 = sst [smem:[#allocation14_spill]] %s3560_s26  ;;  %s2393_s29 = sadd.s32 4294967294, %s3564_s27  }
  0x11   : > { %s3689_s0 = sadd.s32 1, %s3564_s27   ;;  %s41_s30 = sadd.s32 1, %s3560_s26 }
  0x12   : > { %4554 = sst [smem:[#allocation15_spill]] %s3689_s0  ;;  %s38_s18 = ssub.s32 %s3564_s27, %s3689_s0 }
  0x13   : > { %p48_p0 = scmp.ne.s32.totalorder %s3560_s26, %s3556_s25  ;;  %p39_p1 = scmp.eq.s32.totalorder %s38_s18, 0 }
  0x14   : > { %p49_p2 = scmp.eq.s32.totalorder %s3564_s27, 0  ;;  %p54_p3 = scmp.ne.s32.totalorder %s3556_s25, %s3552_s24 }
  0x15   : > { %p4529_p4 = scmp.eq.s32.totalorder %s3685_s28, 0  ;;  %p414_p7 = scmp.eq.s32.totalorder %s3685_s28, 1 }
  0x16   : > { %s3701_s19 = scalar_select %p39_p1, %s3560_s26, %s41_s30  }
  0x17   : > { %p3703_p5 = por %p49_p2, %p48_p0  ;;  %p3709_p6 = por %p4529_p4, %p54_p3 }
  0x18   : > { %4555 = sst [smem:[#allocation16_spill]] %s3701_s19  ;;  %p420_p8 = scmp.eq.s32.totalorder %s2393_s29, 1 }
  0x19   : > { %s4557_s20 = scalar_select %p3709_p6, 1, 0 }
  0x1a   : > { %p2394_p9 = scmp.ge.s32.totalorder %s3564_s27, 1  ;;  %p427_p10 = scmp.lt.s32.totalorder %s3564_s27, 3 }
  0x1b   : > { %p3716_p11 = por %p414_p7, %p48_p0  ;;  %p3720_p12 = por %p420_p8, %p54_p3 }
  0x1c   : > { %p3724_p13 = pnand %p2394_p9, %p427_p10  ;;  %s3566_s30 = smov [#allocation7]  }
  0x1d   : > { %s4558_s21 = scalar_select %p3716_p11, 1, 0 }
  0x1e   : > { %s4560_s22 = scalar_select %p3720_p12, 1, 0 }
  0x1f   : > { %4559 = sst [smem:[#allocation17_spill]] %s4558_s21  ;;  %p3382_p2 = pneg %p3724_p13 }
  0x20   : > { %4561 = sst [smem:[#allocation18_spill]] %s4560_s22  ;;  %s443_s29 = sshll.u32 %s3566_s30, 4  ;;  %s444_s29 = int_to_ptr.vmem [resolvable:$true] %s443_s29 }
  0x21   : > { %s4562_s23 = scalar_select %p3724_p13, 1, 0 }
  0x22   : > { %p3395_p4 = scmp.lt.s32.totalorder %s3564_s27, 2  ;;  %p4563_p0 = scmp.eq.s32.totalorder %s3685_s28, 0 }
  0x23   : > { %s496_s19 = sand.u32 1, %s3560_s26   ;;  %s3436_s16 = scalar_lea.hbm %s4511_s2, 16 }
  0x24   : > { %p3734_p7 = pnand %p3382_p2, %p4563_p0  ;;  %p3741_p3 = pnand %p3395_p4, %p3703_p5 }
  0x25   : > { %s2397_s22 = sshll.u32 %s496_s19, 4  ;;  %p3437_p8 = scmp.ne.s32.totalorder %s4511_s2, %s3436_s16 }
  0x26   : > { %s4565_s0 = scalar_select %p3741_p3, 1, 0 }
  0x27   : > { %p3438_p9 = pneg %p3734_p7  ;;  %p3443_p4 = scmp.lt.u32.totalorder %s3436_s16, %s4511_s2 }
  0x29   : > { %p3439_p10 = pnand %p3438_p9, %p3437_p8 }
  0x2b   : > { %p3440_p2 = pneg %p3439_p10 }
  0x2d   : > { %p3445_p5 = pnand %p3443_p4, %p3440_p2 }
  0x2f   : > { %3448 = shalt.err (!%p3445_p5)
}
  0x30   : > { %s3449_s1 = scalar_lea.vmem %s444_s29, 16  ;;  %s3456_s17 = scalar_lea.vmem %s444_s29, 32 }
  0x31   : > { %p3450_p0 = scmp.ne.s32.totalorder %s444_s29, %s3449_s1  ;;  %p3457_p11 = scmp.lt.s32.totalorder %s444_s29, %s444_s29 }
  0x32   : > { %p3458_p6 = scmp.lt.s32.totalorder %s3456_s17, %s3449_s1 }
  0x33   : > { %p3452_p1 = pnand %p3450_p0, %p3438_p9 }
  0x34   : > { %p3459_p13 = por %p3458_p6, %p3457_p11 }
  0x35   : > { %p3453_p12 = pneg %p3452_p1 }
  0x37   : > { %p3460_p3 = pnand %p3459_p13, %p3453_p12 }
  0x39   : > { %3463 = shalt.err (!%p3460_p3)
}
  0x3a   : > { %3385 = dma.hbm_to_vmem [thread:$0]  (!%p3734_p7), %s4511_s2, 16, %s444_s29, [#allocation8]  }
  0x3b   : > { %s2519_s14 = sshll.u32 %s3564_s27, 8  ;;  %s500_s16 = scalar_lea.vmem [#allocation4], %s2397_s22 }
  0x3c   : > { %s507_s26 = sshll.u32 %s500_s16, 4  ;;  %s4566_s12 = sld [smem:[#allocation19_spill]]  ;;  %s3767_s26 = int_to_ptr.vmem [resolvable:$true] %s507_s26 }
  0x3d   : > { %s3769_s18 = scalar_lea.sflag [#allocation5], %s496_s19  ;;  %p4567_p11 = scmp.ne.s32.totalorder %s4565_s0, 0 }
  0x3f   : > { %p3466_p12 = pneg %p4567_p11 }
  0x42   : > { %s3765_s13 = scalar_lea.hbm %s4566_s12, %s2519_s14  ;;  %s3469_s29 = scalar_lea.hbm %s4566_s12, 512 }
  0x43   : > { %s3464_s1 = scalar_lea.hbm %s3765_s13, 256  ;;  %p3470_p7 = scmp.lt.u32.totalorder %s3765_s13, %s4566_s12 }
  0x44   : > { %p3465_p6 = scmp.ne.s32.totalorder %s3765_s13, %s3464_s1  ;;  %p3471_p3 = scmp.lt.u32.totalorder %s3469_s29, %s3464_s1 }
  0x45   : > { %p3473_p9 = scmp.lt.u32.totalorder %s3464_s1, %s3765_s13 }
  0x46   : > { %p3467_p13 = pnand %p3466_p12, %p3465_p6  ;;  %p3472_p8 = por %p3471_p3, %p3470_p7 }
  0x48   : > { %p3468_p1 = pneg %p3467_p13  ;;  %p3474_p10 = por %p3473_p9, %p3472_p8 }
  0x4a   : > { %p3475_p2 = pnand %p3474_p10, %p3468_p1 }
  0x4c   : > { %3478 = shalt.err (!%p3475_p2)
}
  0x4d   : > { %s3479_s19 = scalar_lea.vmem %s3767_s26, 256  ;;  %s3567_s21 = smov [#allocation4]  }
  0x4e   : > { %p3480_p4 = scmp.ne.s32.totalorder %s3767_s26, %s3479_s19  ;;  %s3484_s14 = sshll.u32 %s3567_s21, 4  ;;  %s3485_s14 = int_to_ptr.vmem [resolvable:$false] %s3484_s14 }
  0x4f   : > { %s3486_s16 = scalar_lea.vmem %s3485_s14, 512  ;;  %p3487_p6 = scmp.lt.s32.totalorder %s3767_s26, %s3485_s14 }
  0x50   : > { %p3482_p5 = pnand %p3480_p4, %p3466_p12  ;;  %p3488_p13 = scmp.lt.s32.totalorder %s3486_s16, %s3479_s19 }
  0x52   : > { %p3483_p0 = pneg %p3482_p5  ;;  %p3489_p7 = por %p3488_p13, %p3487_p6 }
  0x54   : > { %p3490_p3 = pnand %p3489_p7, %p3483_p0 }
  0x56   : > { %3493 = shalt.err (!%p3490_p3)
}
  0x57   : > { %s3568_s30 = smov 128   ;;  %s3569_s1 = smov 8  }
  0x58   : > { %3389 = dma.hbm_to_vmem [thread:$0]  (!%p4567_p11), %s3765_s13, 256, %s3767_s26, %s3769_s18, %s3568_s30, %s3568_s30, %s3569_s1  }
  0x59   : > { %p4568_p12 = scmp.ne.s32.totalorder %s4562_s23, 0 }
  0x5a   : > { %s3800_s22 = sand.u32 (!%p4568_p12), 1, %s3556_s25   ;;  %p4569_p1 = scmp.ne.s32.totalorder (!%p4568_p12), %s4557_s20, 0 }
  0x5b   : > { %519 = sbr.rel (%p4568_p12) target bundleno = 2246 (0x8c6), region = 88  ;;  %s2401_s15 = sshll.u32 (!%p4568_p12), %s3800_s22, 4 }
  0x5c   : > { %s522_s29 = scalar_lea.sflag (!%p4568_p12), [#allocation5], %s3800_s22  ;;  %s525_s17 = scalar_lea.vmem (!%p4568_p12), [#allocation4], %s2401_s15 }
  0x62   : > { %3539 = dma.done.wait (%p4569_p1), %s522_s29, 256  }
  0x63   : > { %3541 = vsyncadd (%p4569_p1), %s522_s29, 4294967040  ;;  %p4570_p8 = scmp.eq.s32.totalorder %s3685_s28, 0 }
  0x65   : > { %3543 = dma.done.wait (%p4570_p8), [#allocation8], 16   ;;  %p4571_p11 = pmov %p4570_p8 }
  0x66   : > { %vm581_vm0 = vcmask 523264   ;;  %vm584_vm1 = vcmask 517120   ;;  %v3570_v0 = vmov 0.0   ;;  %s4572_s20 = sld [smem:[#allocation20_spill]]  ;;  %v579_v9 = vld [vmem:[%s525_s17] sm:$0xff]  ;;  %v580_v10 = vld [vmem:[%s525_s17 + $0x8] sm:$0xff] }
  0x67   : > { %3545 = vsyncadd (%p4571_p11), [#allocation8], 4294967280  ;;  %582 = vst.msk [vmem:[#allocation2] sm:$0xff] %vm581_vm0, %v3570_v0  ;;  %v3571_v45 = vmov 0.0|0.0   ;;  %vm3572_vm2 = vmmov 0   ;;  %v1036_v46 = vld [vmem:[%s4514_s5] sm:$0xff] }
  0x68   : > { %583 = vst.msk [vmem:[#allocation2 + $0x8] sm:$0xff] %vm581_vm0, %v3570_v0  ;;  %1210 = vst.msk [vmem:[#allocation3] sm:$0xff] %vm581_vm0, %v3570_v0  ;;  %3155 = vmatprep.subr.bf16.mxu1 %v3571_v45  ;;  %2812 = vmatprep.mubr.msk.f32.mxu1 %vm3572_vm2, %v3570_v0  ;;  %v1037_v47 = vld [vmem:[%s4514_s5 + $0x8] sm:$0xff]  ;;  %v1038_v48 = vld [vmem:[%s4514_s5 + $0x10] sm:$0xff]  ;;  %vm886_vm3 = vcmask 130048   ;;  %vm1480_vm4 = vcmask 64512  }
  0x69   : > { %585 = vst.msk [vmem:[#allocation2 + $0x10] sm:$0x3] %vm584_vm1, %v3570_v0  ;;  %1211 = vst.msk [vmem:[#allocation3 + $0x8] sm:$0x3] %vm584_vm1, %v3570_v0  ;;  %v3156_v49 = vpack.c.bf16 %v1037_v47, %v1036_v46  ;;  %v1039_v50 = vld [vmem:[%s4514_s5 + $0x18] sm:$0xff]  ;;  %v1040_v52 = vld [vmem:[%s4514_s5 + $0x20] sm:$0xff] }
  0x6a   : > { %586 = vst.msk [vmem:[#allocation2 + $0x1] sm:$0xff] %vm581_vm0, %v579_v9  ;;  %587 = vst.msk [vmem:[#allocation2 + $0x9] sm:$0xff] %vm581_vm0, %v580_v10  ;;  %v3159_v51 = vpack.c.bf16 %v1039_v50, %v1038_v48  ;;  %v1041_v53 = vld [vmem:[%s4514_s5 + $0x28] sm:$0xff]  ;;  %v1042_v55 = vld [vmem:[%s4514_s5 + $0x30] sm:$0xff]  ;;  %s4573_s23 = sld [smem:[#allocation22_spill]]  ;;  %s4574_s30 = sld [smem:[#allocation21_spill]] }
  0x6b   : > { %3157 = vmatpush3.bf16.msra.mxu1 %v3156_v49  ;;  %v3162_v54 = vpack.c.bf16 %v1041_v53, %v1040_v52  ;;  %v1043_v56 = vld [vmem:[%s4514_s5 + $0x38] sm:$0xff]  ;;  %v1044_v58 = vld [vmem:[%s4514_s5 + $0x40] sm:$0xff]  ;;  %v1045_v59 = vld [vmem:[%s4514_s5 + $0x48] sm:$0xff]  ;;  %s4575_s29 = sld [smem:[#allocation24_spill]]  ;;  %s4576_s17 = sld [smem:[#allocation23_spill]]  ;;  %vm2302_vm5 = vcmask 73728  }
  0x6c   : > { %v2403_v1 = vld [vmem:[%s4572_s20 + $0x40] sm:$0xff]  ;;  %v2404_v2 = vld [vmem:[%s4572_s20 + $0x48] sm:$0xff]  ;;  %v2405_v3 = vld [vmem:[%s4572_s20 + $0x50] sm:$0xff]  ;;  %3158 = vmatprep.subr.bf16.mxu1 %v3571_v45  ;;  %v3165_v57 = vpack.c.bf16 %v1043_v56, %v1042_v55  ;;  %v3168_v60 = vpack.c.bf16 %v1045_v59, %v1044_v58  ;;  %s4577_s18 = sld [smem:[#allocation17_spill]]  ;;  %s4578_s21 = sld [smem:[#allocation25_spill]] }
  0x6d   : > { %v3101_v4 = vpack.c.bf16 %v2404_v2, %v2403_v1  ;;  %v2406_v5 = vld [vmem:[%s4572_s20 + $0x58] sm:$0xff]  ;;  %v2407_v7 = vld [vmem:[%s4572_s20 + $0x60] sm:$0xff]  ;;  %v2408_v8 = vld [vmem:[%s4572_s20 + $0x68] sm:$0xff]  ;;  %s2516_s14 = sshll.u32 %s3685_s28, 4  ;;  %s578_s16 = scalar_lea.vmem [#allocation9], %s3800_s22 }
  0x6e   : > { %v3105_v6 = vpack.c.bf16 %v2406_v5, %v2405_v3  ;;  %v3109_v11 = vpack.c.bf16 %v2408_v8, %v2407_v7  ;;  %v2409_v12 = vld [vmem:[%s4572_s20 + $0x70] sm:$0xff]  ;;  %v2410_v13 = vld [vmem:[%s4572_s20 + $0x78] sm:$0xff]  ;;  %v590_v16 = vld [vmem:[%s4572_s20] sm:$0xff]  ;;  %s4579_s13 = sld [smem:[#allocation26_spill]]  ;;  %s2305_s26 = scalar_lea.sflag [#allocation6], %s3800_s22 }
  0x6f   : > { %3102 = vmatprep.subr.bf16.mxu0 %v3101_v4  ;;  %v3113_v14 = vpack.c.bf16 %v2410_v13, %v2409_v12  ;;  %v591_v17 = vld [vmem:[%s4572_s20 + $0x8] sm:$0xff]  ;;  %v592_v19 = vld [vmem:[%s4572_s20 + $0x10] sm:$0xff]  ;;  %v593_v20 = vld [vmem:[%s4572_s20 + $0x18] sm:$0xff]  ;;  %3160 = vmatpush3.bf16.msra.mxu1 %v3159_v51  ;;  %s3573_s28 = smov [#allocation9]  }
  0x70   : > { %3104 = vmatpush3.bf16.msra.mxu0 %v3101_v4  ;;  %v3117_v18 = vpack.c.bf16 %v591_v17, %v590_v16  ;;  %v3121_v22 = vpack.c.bf16 %v593_v20, %v592_v19  ;;  %v594_v24 = vld [vmem:[%s4572_s20 + $0x20] sm:$0xff]  ;;  %v595_v25 = vld [vmem:[%s4572_s20 + $0x28] sm:$0xff]  ;;  %v596_v27 = vld [vmem:[%s4572_s20 + $0x30] sm:$0xff]  ;;  %3161 = vmatprep.subr.bf16.mxu1 %v3571_v45  ;;  %s3498_s24 = sshll.u32 %s3573_s28, 4  ;;  %s3499_s24 = int_to_ptr.vmem [resolvable:$false] %s3498_s24 }
  0x71   : > { %3106 = vmatprep.subr.bf16.mxu0 %v3105_v6  ;;  %v598_v15 = vld [vmem:[#allocation2 + $0x1] sm:$0xff]  ;;  %v599_v21 = vld [vmem:[#allocation2 + $0x9] sm:$0xff]  ;;  %v3125_v26 = vpack.c.bf16 %v595_v25, %v594_v24  ;;  %v597_v28 = vld [vmem:[%s4572_s20 + $0x38] sm:$0xff]  ;;  %s3500_s19 = scalar_lea.vmem %s3499_s24, 32 }
  0x72   : > { %2725 = vmatprep.mubr.msk.f32.mxu0 %vm581_vm0, %v598_v15  ;;  %v588_v23 = vld [vmem:[#allocation2] sm:$0xff]  ;;  %v3129_v29 = vpack.c.bf16 %v597_v28, %v596_v27  ;;  %v2416_v31 = vld [vmem:[%s4572_s20 + $0x88] sm:$0xff]  ;;  %v2417_v33 = vld [vmem:[%s4572_s20 + $0x90] sm:$0xff]  ;;  %p4580_p10 = scmp.ne.s32.totalorder %s4577_s18, 0 }
  0x73   : > { %v2415_v30 = vld [vmem:[%s4572_s20 + $0x80] sm:$0xff]  ;;  %v2418_v34 = vld [vmem:[%s4572_s20 + $0x98] sm:$0xff]  ;;  %v589_v35 = vld [vmem:[#allocation2 + $0x8] sm:$0xff]  ;;  %3163 = vmatpush3.bf16.msra.mxu1 %v3162_v54 }
  0x74   : > { %3108 = vmatpush3.bf16.msra.mxu0 %v3105_v6  ;;  %v3133_v32 = vpack.c.bf16 %v2416_v31, %v2415_v30  ;;  %v3137_v36 = vpack.c.bf16 %v2418_v34, %v2417_v33  ;;  %v771_v37 = vld [vmem:[#allocation2 + $0x2] sm:$0xff]  ;;  %v2421_v41 = vld [vmem:[%s4572_s20 + $0xb0] sm:$0xff]  ;;  %v2422_v42 = vld [vmem:[%s4572_s20 + $0xb8] sm:$0xff]  ;;  %3164 = vmatprep.subr.bf16.mxu1 %v3571_v45  ;;  %s4465_s0 = scalar_lea.hbm %s4579_s13, %s2516_s14 }
  0x75   : > { %3110 = vmatprep.subr.bf16.mxu0 %v3109_v11  ;;  %v2419_v38 = vld [vmem:[%s4572_s20 + $0xa0] sm:$0xff]  ;;  %v2420_v39 = vld [vmem:[%s4572_s20 + $0xa8] sm:$0xff]  ;;  %v3145_v43 = vpack.c.bf16 %v2422_v42, %v2421_v41  ;;  %v1046_v61 = vld [vmem:[%s4514_s5 + $0x50] sm:$0xff] }
  0x76   : > { %v3141_v40 = vpack.c.bf16 %v2420_v39, %v2419_v38  ;;  %v772_v44 = vld [vmem:[#allocation2 + $0xa] sm:$0xff]  ;;  %v1047_v62 = vld [vmem:[%s4514_s5 + $0x58] sm:$0xff]  ;;  %v1048_v1 = vld [vmem:[%s4514_s5 + $0x60] sm:$0xff] }
  0x77   : > { %3166 = vmatpush3.bf16.msra.mxu1 %v3165_v57  ;;  %v3171_v63 = vpack.c.bf16 %v1047_v62, %v1046_v61  ;;  %v1049_v2 = vld [vmem:[%s4514_s5 + $0x68] sm:$0xff]  ;;  %v2426_v6 = vld [vmem:[%s4512_s3] ss:$0 sm:$0xff]  ;;  %v1050_v17 = vld [vmem:[%s4514_s5 + $0x70] sm:$0xff] }
  0x78   : > { %3112 = vmatpush3.bf16.msra.mxu0 %v3109_v11  ;;  %3167 = vmatprep.subr.bf16.mxu1 %v3571_v45  ;;  %v3174_v3 = vpack.c.bf16 %v1049_v2, %v1048_v1  ;;  %v2425_v4 = vld [vmem:[#allocation7] ss:$0 sm:$0xff]  ;;  %v885_v15 = vld [vmem:[%s4513_s4] sm:$0xff]  ;;  %v2432_v28 = vld [vmem:[%s4514_s5 + $0x90] sm:$0xff] }
  0x79   : > { %3114 = vmatprep.subr.bf16.mxu0 %v3113_v14  ;;  %v2428_v16 = vld [vmem:[%s4513_s4 + $0x8] sm:$0xff]  ;;  %v2434_v31 = vld [vmem:[%s4514_s5 + $0xa0] sm:$0xff]  ;;  %v2436_v34 = vld [vmem:[%s4514_s5 + $0xb0] sm:$0xff] }
  0x7a   : > { %v2439_v38 = vld [vmem:[%s4514_s5 + $0xc8] sm:$0xff]  ;;  %v2441_v41 = vld [vmem:[%s4514_s5 + $0xd8] sm:$0xff]  ;;  %v2444_v47 = vld [vmem:[%s4514_s5 + $0xf0] sm:$0xff] }
  0x7b   : > { %3169 = vmatpush3.bf16.msra.mxu1 %v3168_v60  ;;  %v2445_v48 = vld [vmem:[%s4514_s5 + $0xf8] sm:$0xff]  ;;  %v2446_v50 = vld [vmem:[%s4515_s6 + $0x40] sm:$0xff]  ;;  %v2447_v51 = vld [vmem:[%s4515_s6 + $0x48] sm:$0xff] }
  0x7c   : > { %3116 = vmatpush3.bf16.msra.mxu0 %v3113_v14  ;;  %3170 = vmatprep.subr.bf16.mxu1 %v3571_v45  ;;  %v3201_v49 = vpack.c.bf16 %v2445_v48, %v2444_v47  ;;  %v2448_v52 = vld [vmem:[%s4515_s6 + $0x50] sm:$0xff]  ;;  %v3204_v53 = vpack.c.bf16 %v2447_v51, %v2446_v50  ;;  %v2449_v54 = vld [vmem:[%s4515_s6 + $0x58] sm:$0xff]  ;;  %v2450_v56 = vld [vmem:[%s4515_s6 + $0x60] sm:$0xff] }
  0x7d   : > { %3118 = vmatprep.subr.bf16.mxu0 %v3117_v18  ;;  %v3207_v55 = vpack.c.bf16 %v2449_v54, %v2448_v52  ;;  %v2451_v57 = vld [vmem:[%s4515_s6 + $0x68] sm:$0xff]  ;;  %v2452_v59 = vld [vmem:[%s4515_s6 + $0x70] sm:$0xff]  ;;  %v2453_v60 = vld [vmem:[%s4515_s6 + $0x78] sm:$0xff] }
  0x7e   : > { %v3210_v58 = vpack.c.bf16 %v2451_v57, %v2450_v56  ;;  %v3213_v61 = vpack.c.bf16 %v2453_v60, %v2452_v59  ;;  %v2480_v47 = vld [vmem:[%s4519_s10 + $0xd0] sm:$0xff]  ;;  %v2481_v48 = vld [vmem:[%s4519_s10 + $0xd8] sm:$0xff]  ;;  %v2482_v50 = vld [vmem:[%s4519_s10 + $0xe0] sm:$0xff] }
  0x7f   : > { %2726 = vmatmul.mubr.msk.f32.vlgmr.msra.gmra.mrb[0].mxu0 %vm581_vm0, %v599_v21  ;;  %3172 = vmatpush3.bf16.msra.mxu1 %v3171_v63  ;;  %v2483_v51 = vld [vmem:[%s4519_s10 + $0xe8] sm:$0xff]  ;;  %v1479_v60 = vld [vmem:[%s4518_s9] sm:$0xf] }
  0x80   : > { %3120 = vmatpush3.bf16.msra.mxu0 %v3117_v18  ;;  %2744 = vmatprep.mubr.msk.f32.mxu0 %vm581_vm0, %v588_v23  ;;  %v1051_v18 = vld [vmem:[%s4514_s5 + $0x78] sm:$0xff]  ;;  %v2431_v23 = vld [vmem:[%s4514_s5 + $0x88] sm:$0xff]  ;;  %v3282_v52 = vpack.c.bf16 %v2483_v51, %v2482_v50  ;;  %v2141_v50 = vld [vmem:[%s4573_s23 + $0x20] sm:$0xff] }
  0x81   : > { %3122 = vmatprep.subr.bf16.mxu0 %v3121_v22  ;;  %3173 = vmatprep.subr.bf16.mxu1 %v3571_v45  ;;  %v3177_v19 = vpack.c.bf16 %v1051_v18, %v1050_v17  ;;  %v2456_v17 = vld [vmem:[%s4515_s6 + $0x80] sm:$0xff]  ;;  %v2457_v18 = vld [vmem:[%s4515_s6 + $0x88] sm:$0xff] }
  0x82   : > { %v2142_v51 = vld [vmem:[%s4573_s23 + $0x28] sm:$0xff] }
  0x83   : > { %3175 = vmatpush3.bf16.msra.mxu1 %v3174_v3 }
  0x84   : > { %3124 = vmatpush3.bf16.msra.mxu0 %v3121_v22  ;;  %3176 = vmatprep.subr.bf16.mxu1 %v3571_v45  ;;  %v2430_v22 = vld [vmem:[%s4514_s5 + $0x80] sm:$0xff] }
  0x85   : > { %3126 = vmatprep.subr.bf16.mxu0 %v3125_v26  ;;  %v3180_v25 = vpack.c.bf16 %v2431_v23, %v2430_v22 }
  0x87   : > { %3178 = vmatpush3.bf16.msra.mxu1 %v3177_v19  ;;  %v3228_v19 = vpack.c.bf16 %v2457_v18, %v2456_v17  ;;  %v1642_v17 = vld [vmem:[%s4519_s10 + $0x60] sm:$0xff]  ;;  %v1643_v18 = vld [vmem:[%s4519_s10 + $0x68] sm:$0xff] }
  0x88   : > { %3128 = vmatpush3.bf16.msra.mxu0 %v3125_v26  ;;  %3179 = vmatprep.subr.bf16.mxu1 %v3571_v45 }
  0x89   : > { %3130 = vmatprep.subr.bf16.mxu0 %v3129_v29 }
  0x8c   : > { %3132 = vmatpush3.bf16.msra.mxu0 %v3129_v29  ;;  %v2433_v29 = vld [vmem:[%s4514_s5 + $0x98] sm:$0xff] }
  0x8d   : > { %3134 = vmatprep.subr.bf16.mxu0 %v3133_v32  ;;  %v3183_v30 = vpack.c.bf16 %v2433_v29, %v2432_v28  ;;  %v2463_v28 = vld [vmem:[%s4515_s6 + $0xb8] sm:$0xff] }
  0x8f   : > { %2745 = vmatmul.mubr.msk.f32.vlgmr.msra.gmra.mrb[0].mxu0 %vm581_vm0, %v589_v35  ;;  %v2437_v35 = vld [vmem:[%s4514_s5 + $0xb8] sm:$0xff] }
  0x90   : > { %3136 = vmatpush3.bf16.msra.mxu0 %v3133_v32  ;;  %2763 = vmatprep.mubr.msk.f32.mxu0 %vm581_vm0, %v771_v37  ;;  %v2435_v32 = vld [vmem:[%s4514_s5 + $0xa8] sm:$0xff]  ;;  %v2438_v37 = vld [vmem:[%s4514_s5 + $0xc0] sm:$0xff] }
  0x91   : > { %3138 = vmatprep.subr.bf16.mxu0 %v3137_v36  ;;  %v3186_v33 = vpack.c.bf16 %v2435_v32, %v2434_v31  ;;  %v3192_v39 = vpack.c.bf16 %v2439_v38, %v2438_v37  ;;  %v2470_v31 = vld [vmem:[%s4519_s10 + $0x80] sm:$0xff]  ;;  %v2471_v32 = vld [vmem:[%s4519_s10 + $0x88] sm:$0xff] }
  0x92   : > { %v2474_v37 = vld [vmem:[%s4519_s10 + $0xa0] sm:$0xff]  ;;  %v2475_v38 = vld [vmem:[%s4519_s10 + $0xa8] sm:$0xff] }
  0x94   : > { %3140 = vmatpush3.bf16.msra.mxu0 %v3137_v36  ;;  %v3189_v36 = vpack.c.bf16 %v2437_v35, %v2436_v34  ;;  %v2472_v34 = vld [vmem:[%s4519_s10 + $0x90] sm:$0xff]  ;;  %v2473_v35 = vld [vmem:[%s4519_s10 + $0x98] sm:$0xff] }
  0x95   : > { %3142 = vmatprep.subr.bf16.mxu0 %v3141_v40 }
  0x98   : > { %3144 = vmatpush3.bf16.msra.mxu0 %v3141_v40  ;;  %v2440_v40 = vld [vmem:[%s4514_s5 + $0xd0] sm:$0xff] }
  0x99   : > { %3146 = vmatprep.subr.bf16.mxu0 %v3145_v43  ;;  %v3195_v42 = vpack.c.bf16 %v2441_v41, %v2440_v40  ;;  %v2476_v40 = vld [vmem:[%s4519_s10 + $0xb0] sm:$0xff]  ;;  %v2477_v41 = vld [vmem:[%s4519_s10 + $0xb8] sm:$0xff] }
  0x9c   : > { %3148 = vmatpush3.bf16.msra.mxu0 %v3145_v43  ;;  %v2442_v43 = vld [vmem:[%s4514_s5 + $0xe0] sm:$0xff] }
  0x9d   : > { %3149 = vmatprep.subr.bf16.mxu0 %v3571_v45 }
  0x9f   : > { %2764 = vmatmul.mubr.msk.f32.vlgmr.msra.gmra.mrb[0].mxu0 %vm581_vm0, %v772_v44  ;;  %v2443_v44 = vld [vmem:[%s4514_s5 + $0xe8] sm:$0xff] }
  0xa0   : > { %2770 = vmatprep.mubr.msk.f32.mxu0 %vm3572_vm2, %v3570_v0  ;;  %v3198_v46 = vpack.c.bf16 %v2443_v44, %v2442_v43  ;;  %v2478_v43 = vld [vmem:[%s4519_s10 + $0xc0] sm:$0xff]  ;;  %v2479_v44 = vld [vmem:[%s4519_s10 + $0xc8] sm:$0xff] }
 0x172   : > { %v2765_v5 = vpop.f32.mrb[0].mxu0 }
 0x173   : > { %v873_v7 = vmul.f32 %v2765_v5, %v2425_v4  ;;  %v854_v8 = vpop.f32.mrb[1].mxu0  ;;  %v1215_v5 = vld [vmem:[%s4515_s6 + $0x8] sm:$0xff] }
 0x174   : > { %v872_v9 = vmul.f32 %v2425_v4, %v854_v8  ;;  %v1214_v4 = vld [vmem:[%s4515_s6] sm:$0xff]  ;;  %v1217_v8 = vld [vmem:[%s4515_s6 + $0x18] sm:$0xff] }
 0x175   : > { %v882_v10 = vadd.f32 %v2426_v6, %v873_v7  ;;  %v1216_v7 = vld [vmem:[%s4515_s6 + $0x10] sm:$0xff] }
 0x176   : > { %v881_v11 = vadd.f32 %v2426_v6, %v872_v9  ;;  %v3216_v6 = vpack.c.bf16 %v1215_v5, %v1214_v4  ;;  %v1634_v5 = vld [vmem:[%s4519_s10 + $0x20] sm:$0xff] }
 0x177   : > { %v884_v12 = vmax.f32 %v882_v10, 0.0  ;;  %v3219_v10 = vpack.c.bf16 %v1217_v8, %v1216_v7  ;;  %v1636_v8 = vld [vmem:[%s4519_s10 + $0x30] sm:$0xff] }
 0x178   : > { %v883_v13 = vmax.f32 %v881_v11, 0.0  ;;  %v1218_v11 = vld [vmem:[%s4515_s6 + $0x20] sm:$0xff] }
 0x17a   : > { %v3150_v14 = vpack.c.bf16 %v884_v12, %v883_v13  ;;  %v1219_v12 = vld [vmem:[%s4515_s6 + $0x28] sm:$0xff] }
 0x17b   : > { %v3222_v13 = vpack.c.bf16 %v1219_v12, %v1218_v11  ;;  %v1638_v11 = vld [vmem:[%s4519_s10 + $0x40] sm:$0xff]  ;;  %v1639_v12 = vld [vmem:[%s4519_s10 + $0x48] sm:$0xff] }
 0x17c   : > { %3151 = vmatpush3.bf16.msra.mxu0 %v3150_v14 }
 0x17d   : > { %3152 = vmatprep.subr.bf16.mxu0 %v3571_v45 }
 0x17f   : > { %2771 = vmatmul.mubr.msk.f32.vlgmr.msra.gmra.mrb[2].mxu0 %vm886_vm3, %v885_v15  ;;  %v1221_v15 = vld [vmem:[%s4515_s6 + $0x38] sm:$0xff] }
 0x180   : > { %3154 = vmatpush3.bf16.msra.mxu0 %v3150_v14  ;;  %2777 = vmatprep.mubr.msk.f32.mxu0 %vm3572_vm2, %v3570_v0  ;;  %v1220_v14 = vld [vmem:[%s4515_s6 + $0x30] sm:$0xff] }
 0x181   : > { %3203 = vmatprep.subr.bf16.mxu0 %v3571_v45 }
 0x183   : > { %2778 = vmatmul.mubr.msk.f32.vlgmr.msra.gmra.mrb[4].mxu0 %vm886_vm3, %v2428_v16  ;;  %v3225_v16 = vpack.c.bf16 %v1221_v15, %v1220_v14  ;;  %v1640_v14 = vld [vmem:[%s4519_s10 + $0x50] sm:$0xff]  ;;  %v1641_v15 = vld [vmem:[%s4519_s10 + $0x58] sm:$0xff] }
 0x184   : > { %2866 = vmatprep.mubr.msk.f32.mxu0 %vm3572_vm2, %v3570_v0  ;;  %3205 = vmatpush3.bf16.msra.mxu0 %v3204_v53  ;;  %v2465_v53 = vld [vmem:[%s4516_s7] ss:$0 sm:$0xff] }
 0x185   : > { %3206 = vmatprep.subr.bf16.mxu0 %v3571_v45 }
 0x188   : > { %3208 = vmatpush3.bf16.msra.mxu0 %v3207_v55  ;;  %v2466_v55 = vld [vmem:[%s4517_s8] ss:$0 sm:$0xff] }
 0x189   : > { %3209 = vmatprep.subr.bf16.mxu0 %v3571_v45 }
 0x18c   : > { %3211 = vmatpush3.bf16.msra.mxu0 %v3210_v58 }
 0x18d   : > { %3212 = vmatprep.subr.bf16.mxu0 %v3571_v45 }
 0x190   : > { %3214 = vmatpush3.bf16.msra.mxu0 %v3213_v61  ;;  %v1630_v61 = vld [vmem:[%s4519_s10] sm:$0xff] }
 0x191   : > { %3215 = vmatprep.subr.bf16.mxu0 %v3571_v45 }
 0x252   : > { %v956_v20 = vpop.f32.mrb[2].mxu0 }
 0x253   : > { %v2772_v21 = vpop.f32.mrb[3].mxu0 }
 0x254   : > { %v2459_v21 = vld [vmem:[%s4515_s6 + $0x98] sm:$0xff] }
 0x256   : > { %v1031_v24 = vpop.f32.mrb[4].mxu0 }
 0x257   : > { %v1035_v26 = vmax.f32 %v956_v20, %v1031_v24  ;;  %v2779_v27 = vpop.f32.mrb[5].mxu0  ;;  %v2458_v20 = vld [vmem:[%s4515_s6 + $0x90] sm:$0xff]  ;;  %v2460_v24 = vld [vmem:[%s4515_s6 + $0xa0] sm:$0xff] }
 0x258   : > { %v3231_v23 = vpack.c.bf16 %v2459_v21, %v2458_v20  ;;  %v2462_v27 = vld [vmem:[%s4515_s6 + $0xb0] sm:$0xff]  ;;  %v1645_v21 = vld [vmem:[%s4519_s10 + $0x78] sm:$0xff] }
 0x259   : > { %2813 = vmatmul.mubr.f32.vlgmr.msra.gmra.mrb[0].mxu1 %v1035_v26  ;;  %v3237_v29 = vpack.c.bf16 %v2463_v28, %v2462_v27  ;;  %v1644_v20 = vld [vmem:[%s4519_s10 + $0x70] sm:$0xff]  ;;  %v1805_v28 = vld [vmem:[%s4520_s11] sm:$0xff] }
 0x25a   : > { %3181 = vmatpush3.bf16.msra.mxu1 %v3180_v25  ;;  %2847 = vmatprep.mubr.msk.f32.mxu1 %vm3572_vm2, %v3570_v0  ;;  %v2461_v25 = vld [vmem:[%s4515_s6 + $0xa8] sm:$0xff] }
 0x25b   : > { %3182 = vmatprep.subr.bf16.mxu1 %v3571_v45 }
 0x25e   : > { %3184 = vmatpush3.bf16.msra.mxu1 %v3183_v30 }
 0x25f   : > { %3185 = vmatprep.subr.bf16.mxu1 %v3571_v45 }
 0x262   : > { %3187 = vmatpush3.bf16.msra.mxu1 %v3186_v33  ;;  %v3264_v33 = vpack.c.bf16 %v2471_v32, %v2470_v31 }
 0x263   : > { %3188 = vmatprep.subr.bf16.mxu1 %v3571_v45 }
 0x266   : > { %3190 = vmatpush3.bf16.msra.mxu1 %v3189_v36  ;;  %v3267_v36 = vpack.c.bf16 %v2473_v35, %v2472_v34  ;;  %v1807_v34 = vld [vmem:[%s4520_s11 + $0x10] sm:$0xff]  ;;  %v1808_v35 = vld [vmem:[%s4520_s11 + $0x18] sm:$0xff] }
 0x267   : > { %3191 = vmatprep.subr.bf16.mxu1 %v3571_v45 }
 0x26a   : > { %3193 = vmatpush3.bf16.msra.mxu1 %v3192_v39  ;;  %v3270_v39 = vpack.c.bf16 %v2475_v38, %v2474_v37  ;;  %v1809_v37 = vld [vmem:[%s4520_s11 + $0x20] sm:$0xff]  ;;  %v1810_v38 = vld [vmem:[%s4520_s11 + $0x28] sm:$0xff] }
 0x26b   : > { %3194 = vmatprep.subr.bf16.mxu1 %v3571_v45 }
 0x26e   : > { %3196 = vmatpush3.bf16.msra.mxu1 %v3195_v42  ;;  %v3273_v42 = vpack.c.bf16 %v2477_v41, %v2476_v40  ;;  %v1811_v40 = vld [vmem:[%s4520_s11 + $0x30] sm:$0xff]  ;;  %v1812_v41 = vld [vmem:[%s4520_s11 + $0x38] sm:$0xff] }
 0x26f   : > { %3197 = vmatprep.subr.bf16.mxu1 %v3571_v45 }
 0x272   : > { %3199 = vmatpush3.bf16.msra.mxu1 %v3198_v46  ;;  %v3276_v46 = vpack.c.bf16 %v2479_v44, %v2478_v43  ;;  %v2137_v43 = vld [vmem:[%s4573_s23] sm:$0xff]  ;;  %v2138_v44 = vld [vmem:[%s4573_s23 + $0x8] sm:$0xff] }
 0x273   : > { %3200 = vmatprep.subr.bf16.mxu1 %v3571_v45 }
 0x276   : > { %3202 = vmatpush3.bf16.msra.mxu1 %v3201_v49  ;;  %v3279_v49 = vpack.c.bf16 %v2481_v48, %v2480_v47  ;;  %v3336_v47 = vpack.c.bf16 %v2138_v44, %v2137_v43  ;;  %v2140_v48 = vld [vmem:[%s4573_s23 + $0x18] sm:$0xff] }
 0x277   : > { %2907 = vmatprep.subr.mxu1 %v3570_v0 }
 0x279   : > { %2848 = vmatmul.mubr.f32.vlgmr.msra.gmra.mrb[2].mxu1 %v1035_v26  ;;  %v3234_v26 = vpack.c.bf16 %v2461_v25, %v2460_v24  ;;  %v2485_v24 = vld [vmem:[%s4519_s10 + $0xf8] sm:$0xff] }
 0x27a   : > { %2909 = vmatprep.mubr.msk.f32.mxu1 %vm3572_vm2, %v3570_v0 }
 0x32c   : > { %v1118_v62 = vpop.f32.mrb[0].mxu1 }
 0x32d   : > { %v2814_v63 = vpop.f32.mrb[1].mxu1 }
 0x32e   : > { %v2468_v63 = vld [vmem:[%s4518_s9 + $0x4] sm:$0xf] }
 0x34c   : > { %v1205_v1 = vpop.f32.mrb[2].mxu1 }
 0x34d   : > { %v1209_v2 = vmax.f32 %v1118_v62, %v1205_v1  ;;  %v2849_v3 = vpop.f32.mrb[3].mxu1  ;;  %v1631_v62 = vld [vmem:[%s4519_s10 + $0x8] sm:$0xff] }
 0x34e   : > { %v3240_v1 = vpack.c.bf16 %v1631_v62, %v1630_v61  ;;  %v1633_v3 = vld [vmem:[%s4519_s10 + $0x18] sm:$0xff]  ;;  %v2489_v61 = vld [vmem:[%s4520_s11 + $0x50] sm:$0xff] }
 0x34f   : > { %1212 = vst.msk [vmem:[#allocation3 + $0x1] sm:$0xff] %vm581_vm0, %v1209_v2  ;;  %v1632_v2 = vld [vmem:[%s4519_s10 + $0x10] sm:$0xff]  ;;  %v2490_v62 = vld [vmem:[%s4520_s11 + $0x58] sm:$0xff] }
 0x350   : > { %v3243_v4 = vpack.c.bf16 %v1633_v3, %v1632_v2  ;;  %v2492_v2 = vld [vmem:[%s4520_s11 + $0x68] sm:$0xff] }
 0x356   : > { %v1222_v9 = vld [vmem:[#allocation3 + $0x1] sm:$0xff] }
 0x357   : > { %2867 = vmatmul.mubr.msk.f32.vlgmr.msra.gmra.mrb[6].mxu0 %vm581_vm0, %v1222_v9  ;;  %v1213_v22 = vld [vmem:[#allocation3] sm:$0xff] }
 0x358   : > { %3217 = vmatpush3.bf16.msra.mxu0 %v3216_v6  ;;  %2885 = vmatprep.mubr.msk.f32.mxu0 %vm3572_vm2, %v3570_v0  ;;  %v1378_v30 = vld [vmem:[#allocation3 + $0x2] sm:$0xff]  ;;  %v1635_v6 = vld [vmem:[%s4519_s10 + $0x28] sm:$0xff] }
 0x359   : > { %3218 = vmatprep.subr.bf16.mxu0 %v3571_v45  ;;  %v3246_v7 = vpack.c.bf16 %v1635_v6, %v1634_v5  ;;  %v1637_v9 = vld [vmem:[%s4519_s10 + $0x38] sm:$0xff] }
 0x35a   : > { %v2494_v5 = vld [vmem:[%s4520_s11 + $0x78] sm:$0xff] }
 0x35c   : > { %3220 = vmatpush3.bf16.msra.mxu0 %v3219_v10  ;;  %v3249_v10 = vpack.c.bf16 %v1637_v9, %v1636_v8  ;;  %v2497_v8 = vld [vmem:[%s4520_s11 + $0x88] sm:$0xff] }
 0x35d   : > { %3221 = vmatprep.subr.bf16.mxu0 %v3571_v45 }
 0x360   : > { %3223 = vmatpush3.bf16.msra.mxu0 %v3222_v13  ;;  %v3252_v13 = vpack.c.bf16 %v1639_v12, %v1638_v11  ;;  %v2498_v11 = vld [vmem:[%s4520_s11 + $0x90] sm:$0xff]  ;;  %v2499_v12 = vld [vmem:[%s4520_s11 + $0x98] sm:$0xff] }
 0x361   : > { %3224 = vmatprep.subr.bf16.mxu0 %v3571_v45 }
 0x364   : > { %3226 = vmatpush3.bf16.msra.mxu0 %v3225_v16  ;;  %v3255_v16 = vpack.c.bf16 %v1641_v15, %v1640_v14  ;;  %v2500_v14 = vld [vmem:[%s4520_s11 + $0xa0] sm:$0xff]  ;;  %v2501_v15 = vld [vmem:[%s4520_s11 + $0xa8] sm:$0xff] }
 0x365   : > { %3227 = vmatprep.subr.bf16.mxu0 %v3571_v45 }
 0x367   : > { %2886 = vmatmul.mubr.msk.f32.vlgmr.msra.gmra.mrb[6].mxu0 %vm581_vm0, %v1213_v22  ;;  %v2484_v22 = vld [vmem:[%s4519_s10 + $0xf0] sm:$0xff] }
 0x368   : > { %3229 = vmatpush3.bf16.msra.mxu0 %v3228_v19  ;;  %2904 = vmatprep.mubr.msk.f32.mxu0 %vm3572_vm2, %v3570_v0  ;;  %v3258_v19 = vpack.c.bf16 %v1643_v18, %v1642_v17  ;;  %v3285_v25 = vpack.c.bf16 %v2485_v24, %v2484_v22  ;;  %v2502_v17 = vld [vmem:[%s4520_s11 + $0xb0] sm:$0xff]  ;;  %v2503_v18 = vld [vmem:[%s4520_s11 + $0xb8] sm:$0xff] }
 0x369   : > { %3230 = vmatprep.subr.bf16.mxu0 %v3571_v45  ;;  %v2507_v24 = vld [vmem:[%s4520_s11 + $0xd0] sm:$0xff] }
 0x36c   : > { %3232 = vmatpush3.bf16.msra.mxu0 %v3231_v23  ;;  %v3261_v23 = vpack.c.bf16 %v1645_v21, %v1644_v20  ;;  %v2505_v20 = vld [vmem:[%s4520_s11 + $0xc0] sm:$0xff]  ;;  %v2506_v21 = vld [vmem:[%s4520_s11 + $0xc8] sm:$0xff] }
 0x36d   : > { %3233 = vmatprep.subr.bf16.mxu0 %v3571_v45  ;;  %v3324_v22 = vpack.c.bf16 %v2506_v21, %v2505_v20 }
 0x370   : > { %3235 = vmatpush3.bf16.msra.mxu0 %v3234_v26 }
 0x371   : > { %3236 = vmatprep.subr.bf16.mxu0 %v3571_v45 }
 0x374   : > { %3238 = vmatpush3.bf16.msra.mxu0 %v3237_v29  ;;  %v1806_v29 = vld [vmem:[%s4520_s11 + $0x8] sm:$0xff] }
 0x375   : > { %3263 = vmatprep.subr.bf16.mxu0 %v3571_v45  ;;  %v3288_v31 = vpack.c.bf16 %v1806_v29, %v1805_v28  ;;  %v2510_v28 = vld [vmem:[%s4520_s11 + $0xe8] sm:$0xff] }
 0x377   : > { %2905 = vmatmul.mubr.msk.f32.vlgmr.msra.gmra.mrb[6].mxu0 %vm581_vm0, %v1378_v30 }
 0x378   : > { %2984 = vmatprep.mubr.msk.f32.mxu0 %vm3572_vm2, %v3570_v0  ;;  %3265 = vmatpush3.bf16.msra.mxu0 %v3264_v33 }
 0x379   : > { %3266 = vmatprep.subr.bf16.mxu0 %v3571_v45 }
 0x37c   : > { %3268 = vmatpush3.bf16.msra.mxu0 %v3267_v36  ;;  %v3291_v36 = vpack.c.bf16 %v1808_v35, %v1807_v34  ;;  %v2143_v34 = vld [vmem:[%s4573_s23 + $0x30] sm:$0xff]  ;;  %v2144_v35 = vld [vmem:[%s4573_s23 + $0x38] sm:$0xff] }
 0x37d   : > { %3269 = vmatprep.subr.bf16.mxu0 %v3571_v45 }
 0x380   : > { %3271 = vmatpush3.bf16.msra.mxu0 %v3270_v39  ;;  %v3294_v39 = vpack.c.bf16 %v1810_v38, %v1809_v37  ;;  %v1804_v37 = vld [vmem:[%s4574_s30] sm:$0x1]  ;;  %s2317_s30 = sshll.u32 %s578_s16, 4  ;;  %s4467_s30 = int_to_ptr.vmem [resolvable:$true] %s2317_s30 }
 0x381   : > { %3272 = vmatprep.subr.bf16.mxu0 %v3571_v45  ;;  %v2220_v38 = vld [vmem:[%s4575_s29] sm:$0xff]  ;;  %p3501_p5 = scmp.lt.s32.totalorder %s4467_s30, %s3499_s24 }
 0x384   : > { %3274 = vmatpush3.bf16.msra.mxu0 %v3273_v42  ;;  %v3297_v42 = vpack.c.bf16 %v1812_v41, %v1811_v40 }
 0x385   : > { %3275 = vmatprep.subr.bf16.mxu0 %v3571_v45 }
 0x388   : > { %3277 = vmatpush3.bf16.msra.mxu0 %v3276_v46  ;;  %v2139_v46 = vld [vmem:[%s4573_s23 + $0x10] sm:$0xff] }
 0x389   : > { %3278 = vmatprep.subr.bf16.mxu0 %v3571_v45 }
 0x38c   : > { %3280 = vmatpush3.bf16.msra.mxu0 %v3279_v49  ;;  %v3339_v49 = vpack.c.bf16 %v2140_v48, %v2139_v46  ;;  %v2222_v46 = vld [vmem:[%s4575_s29 + $0x10] sm:$0xff] }
 0x38d   : > { %3281 = vmatprep.subr.bf16.mxu0 %v3571_v45 }
 0x390   : > { %3283 = vmatpush3.bf16.msra.mxu0 %v3282_v52  ;;  %v3342_v52 = vpack.c.bf16 %v2142_v51, %v2141_v50  ;;  %v2225_v50 = vld [vmem:[%s4575_s29 + $0x28] sm:$0xff] }
 0x391   : > { %3284 = vmatprep.subr.bf16.mxu0 %v3571_v45 }
 0x394   : > { %3286 = vmatpush3.bf16.msra.mxu0 %v3285_v25  ;;  %v2508_v25 = vld [vmem:[%s4520_s11 + $0xd8] sm:$0xff] }
 0x395   : > { %3335 = vmatprep.subr.bf16.mxu0 %v3571_v45 }
 0x44a   : > { %v1457_v54 = vpop.f32.mrb[6].mxu0 }
 0x44b   : > { %v1469_v56 = vmul.f32 %v2465_v53, %v1457_v54  ;;  %v2906_v57 = vpop.f32.mrb[7].mxu0  ;;  %v2487_v53 = vld [vmem:[%s4520_s11 + $0x40] sm:$0xff]  ;;  %v2488_v54 = vld [vmem:[%s4520_s11 + $0x48] sm:$0xff] }
 0x44c   : > { %v3300_v57 = vpack.c.bf16 %v2488_v54, %v2487_v53  ;;  %v2145_v54 = vld [vmem:[%s4576_s17] sm:$0x1]  ;;  %s3494_s17 = scalar_lea.vmem %s4467_s30, 16 }
 0x44d   : > { %v1477_v58 = vadd.f32 %v2466_v55, %v1469_v56  ;;  %p3495_p9 = scmp.ne.s32.totalorder %s4467_s30, %s3494_s17  ;;  %p3502_p0 = scmp.lt.s32.totalorder %s3500_s19, %s3494_s17 }
 0x44f   : > { %v1478_v59 = vmax.f32 %v1477_v58, 0.0  ;;  %p3496_p2 = pnand %p3495_p9, %p4580_p10  ;;  %p3503_p6 = por %p3502_p0, %p3501_p5 }
 0x451   : > { %2908 = vmatpush3.msra.mxu1 %v1478_v59  ;;  %p3497_p4 = pneg %p3496_p2 }
 0x452   : > { %2910 = vmatmul.mubr.msk.f32.vlgmr.msra.gmra.mrb[4].mxu1 %vm1480_vm4, %v1479_v60  ;;  %2912 = vmatprep.subr.mxu1 %v3570_v0 }
 0x453   : > { %2913 = vmatpush3.msra.mxu1 %v1478_v59  ;;  %2914 = vmatprep.mubr.msk.f32.mxu1 %vm3572_vm2, %v3570_v0  ;;  %p3504_p13 = pnand %p3503_p6, %p3497_p4 }
 0x454   : > { %3239 = vmatprep.subr.bf16.mxu1 %v3571_v45 }
 0x456   : > { %2915 = vmatmul.mubr.msk.f32.vlgmr.msra.gmra.mrb[6].mxu1 %vm1480_vm4, %v2468_v63  ;;  %v3303_v63 = vpack.c.bf16 %v2490_v62, %v2489_v61 }
 0x457   : > { %3241 = vmatpush3.bf16.msra.mxu1 %v3240_v1  ;;  %2949 = vmatprep.mubr.msk.f32.mxu1 %vm3572_vm2, %v3570_v0  ;;  %v2491_v1 = vld [vmem:[%s4520_s11 + $0x60] sm:$0xff] }
 0x458   : > { %3242 = vmatprep.subr.bf16.mxu1 %v3571_v45  ;;  %v3306_v3 = vpack.c.bf16 %v2492_v2, %v2491_v1 }
 0x45b   : > { %3244 = vmatpush3.bf16.msra.mxu1 %v3243_v4  ;;  %v2493_v4 = vld [vmem:[%s4520_s11 + $0x70] sm:$0xff] }
 0x45c   : > { %3245 = vmatprep.subr.bf16.mxu1 %v3571_v45  ;;  %v3309_v6 = vpack.c.bf16 %v2494_v5, %v2493_v4 }
 0x45f   : > { %3247 = vmatpush3.bf16.msra.mxu1 %v3246_v7  ;;  %v2496_v7 = vld [vmem:[%s4520_s11 + $0x80] sm:$0xff] }
 0x460   : > { %3248 = vmatprep.subr.bf16.mxu1 %v3571_v45  ;;  %v3312_v9 = vpack.c.bf16 %v2497_v8, %v2496_v7 }
 0x463   : > { %3250 = vmatpush3.bf16.msra.mxu1 %v3249_v10 }
 0x464   : > { %3251 = vmatprep.subr.bf16.mxu1 %v3571_v45 }
 0x467   : > { %3253 = vmatpush3.bf16.msra.mxu1 %v3252_v13  ;;  %v3315_v13 = vpack.c.bf16 %v2499_v12, %v2498_v11 }
 0x468   : > { %3254 = vmatprep.subr.bf16.mxu1 %v3571_v45 }
 0x46b   : > { %3256 = vmatpush3.bf16.msra.mxu1 %v3255_v16  ;;  %v3318_v16 = vpack.c.bf16 %v2501_v15, %v2500_v14 }
 0x46c   : > { %3257 = vmatprep.subr.bf16.mxu1 %v3571_v45 }
 0x46f   : > { %3259 = vmatpush3.bf16.msra.mxu1 %v3258_v19  ;;  %v3321_v19 = vpack.c.bf16 %v2503_v18, %v2502_v17 }
 0x470   : > { %3260 = vmatprep.subr.bf16.mxu1 %v3571_v45 }
 0x473   : > { %3262 = vmatpush3.bf16.msra.mxu1 %v3261_v23 }
 0x474   : > { %3287 = vmatprep.subr.bf16.mxu1 %v3571_v45 }
 0x525   : > { %v1550_v26 = vpop.f32.mrb[4].mxu1 }
 0x526   : > { %v2911_v27 = vpop.f32.mrb[5].mxu1 }
 0x527   : > { %v2509_v27 = vld [vmem:[%s4520_s11 + $0xe0] sm:$0xff] }
 0x528   : > { %v3330_v29 = vpack.c.bf16 %v2510_v28, %v2509_v27 }
 0x529   : > { %v1625_v30 = vpop.f32.mrb[6].mxu1 }
 0x52a   : > { %v1629_v32 = vmax.f32 %v1550_v26, %v1625_v30  ;;  %v2916_v33 = vpop.f32.mrb[7].mxu1  ;;  %v3327_v26 = vpack.c.bf16 %v2508_v25, %v2507_v24  ;;  %v2511_v30 = vld [vmem:[%s4520_s11 + $0xf0] sm:$0xff] }
 0x52c   : > { %2950 = vmatmul.mubr.f32.vlgmr.msra.gmra.mrb[8].mxu1 %v1629_v32  ;;  %2985 = vmatmul.mubr.f32.vlgmr.msra.gmra.mrb[8].mxu0 %v1629_v32 }
 0x52d   : > { %3289 = vmatpush3.bf16.msra.mxu1 %v3288_v31  ;;  %3003 = vmatprep.mubr.msk.f32.mxu1 %vm3572_vm2, %v3570_v0  ;;  %v2512_v31 = vld [vmem:[%s4520_s11 + $0xf8] sm:$0xff] }
 0x52e   : > { %3290 = vmatprep.subr.bf16.mxu1 %v3571_v45  ;;  %3079 = vmatprep.mubr.msk.f32.mxu0 %vm3572_vm2, %v3570_v0  ;;  %v3333_v32 = vpack.c.bf16 %v2512_v31, %v2511_v30 }
 0x52f   : > { %3337 = vmatpush3.bf16.msra.mxu0 %v3336_v47  ;;  %v2223_v47 = vld [vmem:[%s4575_s29 + $0x18] sm:$0xff] }
 0x530   : > { %3338 = vmatprep.subr.bf16.mxu0 %v3571_v45  ;;  %v3351_v48 = vpack.c.bf16 %v2223_v47, %v2222_v46 }
 0x531   : > { %3292 = vmatpush3.bf16.msra.mxu1 %v3291_v36  ;;  %v3345_v36 = vpack.c.bf16 %v2144_v35, %v2143_v34 }
 0x532   : > { %3293 = vmatprep.subr.bf16.mxu1 %v3571_v45 }
 0x533   : > { %3340 = vmatpush3.bf16.msra.mxu0 %v3339_v49  ;;  %v2224_v49 = vld [vmem:[%s4575_s29 + $0x20] sm:$0xff] }
 0x534   : > { %3341 = vmatprep.subr.bf16.mxu0 %v3571_v45  ;;  %v3354_v51 = vpack.c.bf16 %v2225_v50, %v2224_v49 }
 0x535   : > { %3295 = vmatpush3.bf16.msra.mxu1 %v3294_v39  ;;  %v2221_v39 = vld [vmem:[%s4575_s29 + $0x8] sm:$0xff] }
 0x536   : > { %3296 = vmatprep.subr.bf16.mxu1 %v3571_v45  ;;  %v3348_v43 = vpack.c.bf16 %v2221_v39, %v2220_v38 }
 0x537   : > { %3343 = vmatpush3.bf16.msra.mxu0 %v3342_v52  ;;  %v2227_v52 = vld [vmem:[%s4575_s29 + $0x38] sm:$0xff] }
 0x538   : > { %3344 = vmatprep.subr.bf16.mxu0 %v3571_v45 }
 0x539   : > { %3298 = vmatpush3.bf16.msra.mxu1 %v3297_v42 }
 0x53a   : > { %3299 = vmatprep.subr.bf16.mxu1 %v3571_v45 }
 0x53b   : > { %3346 = vmatpush3.bf16.msra.mxu0 %v3345_v36 }
 0x53c   : > { %3347 = vmatprep.subr.bf16.mxu0 %v3571_v45 }
 0x5ff   : > { %v1712_v55 = vpop.f32.mrb[8].mxu1  ;;  %v1799_v56 = vpop.f32.mrb[8].mxu0 }
 0x600   : > { %v4320_v58 = vmax.f32 %v1712_v55, %v1799_v56  ;;  %v2951_v59 = vpop.f32.mrb[9].mxu1  ;;  %v2986_v60 = vpop.f32.mrb[9].mxu0 }
 0x602   : > { %3004 = vmatmul.mubr.msk.f32.vlgmr.msra.gmra.mrb[10].mxu1 %vm581_vm0, %v4320_v58  ;;  %v1896_v10 = vrot.slane %v4320_v58, 1  ;;  %v1979_v23 = vrot.slane %v4320_v58, 2  ;;  %v2062_v33 = vrot.slane %v4320_v58, 3 }
 0x603   : > { %3301 = vmatpush3.bf16.msra.mxu1 %v3300_v57  ;;  %3022 = vmatprep.mubr.msk.f32.mxu1 %vm3572_vm2, %v3570_v0 }
 0x604   : > { %3302 = vmatprep.subr.bf16.mxu1 %v3571_v45 }
 0x607   : > { %3304 = vmatpush3.bf16.msra.mxu1 %v3303_v63 }
 0x608   : > { %3305 = vmatprep.subr.bf16.mxu1 %v3571_v45 }
 0x60b   : > { %3307 = vmatpush3.bf16.msra.mxu1 %v3306_v3 }
 0x60c   : > { %3308 = vmatprep.subr.bf16.mxu1 %v3571_v45 }
 0x60f   : > { %3310 = vmatpush3.bf16.msra.mxu1 %v3309_v6 }
 0x610   : > { %3311 = vmatprep.subr.bf16.mxu1 %v3571_v45 }
 0x612   : > { %3023 = vmatmul.mubr.msk.f32.vlgmr.msra.gmra.mrb[10].mxu1 %vm581_vm0, %v1896_v10 }
 0x613   : > { %3313 = vmatpush3.bf16.msra.mxu1 %v3312_v9  ;;  %3041 = vmatprep.mubr.msk.f32.mxu1 %vm3572_vm2, %v3570_v0 }
 0x614   : > { %3314 = vmatprep.subr.bf16.mxu1 %v3571_v45 }
 0x617   : > { %3316 = vmatpush3.bf16.msra.mxu1 %v3315_v13 }
 0x618   : > { %3317 = vmatprep.subr.bf16.mxu1 %v3571_v45 }
 0x61b   : > { %3319 = vmatpush3.bf16.msra.mxu1 %v3318_v16 }
 0x61c   : > { %3320 = vmatprep.subr.bf16.mxu1 %v3571_v45 }
 0x61f   : > { %3322 = vmatpush3.bf16.msra.mxu1 %v3321_v19 }
 0x620   : > { %3323 = vmatprep.subr.bf16.mxu1 %v3571_v45 }
 0x622   : > { %3042 = vmatmul.mubr.msk.f32.vlgmr.msra.gmra.mrb[10].mxu1 %vm581_vm0, %v1979_v23 }
 0x623   : > { %3325 = vmatpush3.bf16.msra.mxu1 %v3324_v22  ;;  %3060 = vmatprep.mubr.msk.f32.mxu1 %vm3572_vm2, %v3570_v0 }
 0x624   : > { %3326 = vmatprep.subr.bf16.mxu1 %v3571_v45 }
 0x627   : > { %3328 = vmatpush3.bf16.msra.mxu1 %v3327_v26 }
 0x628   : > { %3329 = vmatprep.subr.bf16.mxu1 %v3571_v45 }
 0x62b   : > { %3331 = vmatpush3.bf16.msra.mxu1 %v3330_v29 }
 0x62c   : > { %3332 = vmatprep.subr.bf16.mxu1 %v3571_v45 }
 0x62f   : > { %3334 = vmatpush3.bf16.msra.mxu1 %v3333_v32 }
 0x632   : > { %3061 = vmatmul.mubr.msk.f32.vlgmr.msra.gmra.mrb[10].mxu1 %vm581_vm0, %v2062_v33 }
 0x705   : > { %v2131_v40 = vpop.f32.mrb[10].mxu1 }
 0x706   : > { %v3359_v41 = vadd.f32 %v2131_v40, %v1804_v37  ;;  %v3062_v42 = vpop.f32.mrb[11].mxu1 }
 0x708   : > { %v2136_v44 = vmax.f32 %v3359_v41, 0.0 }
 0x70a   : > { %3080 = vmatmul.mubr.msk.f32.vlgmr.msra.gmra.mrb[10].mxu0 %vm581_vm0, %v2136_v44 }
 0x70b   : > { %3349 = vmatpush3.bf16.msra.mxu0 %v3348_v43  ;;  %3098 = vmatprep.mubr.msk.f32.mxu0 %vm3572_vm2, %v3570_v0  ;;  %v2226_v0 = vld [vmem:[%s4575_s29 + $0x30] sm:$0xff] }
 0x70c   : > { %3350 = vmatprep.subr.bf16.mxu0 %v3571_v45  ;;  %v3357_v53 = vpack.c.bf16 %v2227_v52, %v2226_v0 }
 0x70f   : > { %3352 = vmatpush3.bf16.msra.mxu0 %v3351_v48 }
 0x710   : > { %3353 = vmatprep.subr.bf16.mxu0 %v3571_v45 }
 0x713   : > { %3355 = vmatpush3.bf16.msra.mxu0 %v3354_v51 }
 0x714   : > { %3356 = vmatprep.subr.bf16.mxu0 %v3571_v45  ;;  %v2228_v45 = vld [vmem:[%s4578_s21] sm:$0x1] }
 0x717   : > { %3358 = vmatpush3.bf16.msra.mxu0 %v3357_v53 }
 0x7dd   : > { %v2215_v55 = vpop.f32.mrb[10].mxu0 }
 0x7de   : > { %v2216_v56 = vadd.f32 %v2215_v55, %v2145_v54  ;;  %v3081_v57 = vpop.f32.mrb[11].mxu0 }
 0x7e0   : > { %v2219_v58 = vmax.f32 %v2216_v56, 0.0 }
 0x7e2   : > { %3099 = vmatmul.mubr.msk.f32.vlgmr.msra.gmra.mrb[12].mxu0 %vm581_vm0, %v2219_v58 }
 0x8b5   : > { %v2298_v59 = vpop.f32.mrb[12].mxu0 }
 0x8b6   : > { %v2299_v60 = vadd.f32 %v2298_v59, %v2228_v45  ;;  %v3100_v61 = vpop.f32.mrb[13].mxu0 }
 0x8b8   : > { %2303 = vst.msk [vmem:[%s578_s16] sm:$0x1] %vm2302_vm5, %v2299_v60 }
 0x8b9   : > { %3507 = shalt.err (!%p3504_p13)
}
 0x8ba   : > { %s3508_s22 = scalar_lea.hbm %s4465_s0, 16  ;;  %s3512_s16 = scalar_lea.hbm %s4579_s13, 32 }
 0x8bb   : > { %p3509_p7 = scmp.ne.s32.totalorder %s4465_s0, %s3508_s22  ;;  %p3513_p1 = scmp.lt.u32.totalorder %s4465_s0, %s4579_s13 }
 0x8bc   : > { %p3514_p8 = scmp.lt.u32.totalorder %s3512_s16, %s3508_s22  ;;  %p3516_p9 = scmp.lt.u32.totalorder %s3508_s22, %s4465_s0 }
 0x8bd   : > { %p3510_p3 = pnand %p3509_p7, %p4580_p10 }
 0x8be   : > { %p3515_p11 = por %p3514_p8, %p3513_p1 }
 0x8bf   : > { %p3511_p12 = pneg %p3510_p3 }
 0x8c0   : > { %p3517_p2 = por %p3516_p9, %p3515_p11 }
 0x8c2   : > { %p3518_p4 = pnand %p3517_p2, %p3511_p12 }
 0x8c4   : > { %3521 = shalt.err (!%p3518_p4)
}
 0x8c5   : > { %3380 = dma.vmem_to_hbm [thread:$0]  (%p4580_p10), %s4467_s30, 16, %s4465_s0, %s2305_s26  }
 0x8c6 PF: > { %s4581_s17 = sld [smem:[#allocation13_spill]]  ;;  %s4582_s28 = sld [smem:[#allocation18_spill]] }
 0x8c7   : > { %p4584_p0 = scmp.ge.s32.totalorder %s3564_s27, 2 }
 0x8cc   : > { %s2329_s24 = sand.u32 1, %s4581_s17   ;;  %p4583_p5 = scmp.ne.s32.totalorder %s4582_s28, 0 }
 0x8cd   : > { %s2330_s19 = scalar_lea.sflag [#allocation6], %s2329_s24 }
 0x8ce   : > { %p3391_p6 = pnand %p4584_p0, %p4583_p5 }
 0x8d0   : > { %3547 = dma.done.wait (!%p3391_p6), %s2330_s19, 16  }
 0x8d1   : > { %3549 = vsyncadd (!%p3391_p6), %s2330_s19, 4294967280  ;;  %s4585_s27 = sld [smem:[#allocation15_spill]]  ;;  %s4586_s22 = sld [smem:[#allocation14_spill]] }
 0x8d2   : > { %s4587_s26 = sld [smem:[#allocation16_spill]]  ;;  %s4588_s24 = smov %s3556_s25 }
 0x8d7   : > { %p31_p13 = scmp.ge.s32.totalorder %s4585_s27, 4   ;;  %s4589_s25 = smov %s4586_s22 }
 0x8d9   :  { %33 = sbr.rel (!%p31_p13) target bundleno = 15 (0xf), region = 148 }
 0x8e0   :  { %2334 = vsyncpa [#allocation5], 1 }
 0x8e1   :  { %2336 = vsyncpa [#allocation5 + $0x1], 1 }
 0x8e2   :  { %2337 = vsyncpa [#allocation8], 1 }
 0x8e3   :  { %2338 = vsyncpa [#allocation6], 1 }
 0x8e4   :  { %2340 = vsyncpa [#allocation6 + $0x1], 1 }

</bundles_post_ra>
